<compile_context>
chip_gen: v6e
topology: v6e:2x2x1
jax: 0.10.0
libtpu: 0.0.40
codegen_flags: <defaults>
</compile_context>

<pallas_src>
import functools

import numpy as np
import jax
import jax.numpy as jnp
from jax import lax
from jax.experimental import pallas as pl
from jax.experimental.pallas import tpu as pltpu

EPS = 1e-5  # nn.BatchNorm2d default eps


# ----------------------------- constant-matrix builders -----------------------------

def _bilinear_matrix(n_in, n_out):
    """M (n_out, n_in): y = M @ x == 1-D bilinear resize, align_corners=True."""
    if n_out == 1:
        src = np.zeros((1,), np.float64)
    else:
        src = np.arange(n_out, dtype=np.float64) * (n_in - 1) / (n_out - 1)
    i0 = np.clip(np.floor(src).astype(np.int64), 0, n_in - 1)
    i1 = np.clip(i0 + 1, 0, n_in - 1)
    frac = src - i0
    m = np.zeros((n_out, n_in), np.float32)
    m[np.arange(n_out), i0] += (1.0 - frac).astype(np.float32)
    m[np.arange(n_out), i1] += frac.astype(np.float32)
    return m


def _block_diag(m, n):
    r, c = m.shape
    out = np.zeros((n * r, n * c), np.float32)
    for i in range(n):
        out[i * r:(i + 1) * r, i * c:(i + 1) * c] = m
    return out


def _upsample_place_matrices(H1, W1, H, W, C1, Bt):
    """R_big (Bt*H, Bt*H1), P_big (C1*W1, C1*W): for Bt row-stacked
    planar-folded images, R_big @ x1_rows @ P_big == bilinear x2 upsample of
    each (H1, W1) plane followed by the centring zero pad of Up.forward."""
    dY0 = (H - 2 * H1) // 2
    dX0 = (W - 2 * W1) // 2
    uh = _bilinear_matrix(H1, 2 * H1)                    # (2H1, H1)
    uw = _bilinear_matrix(W1, 2 * W1)                    # (2W1, W1)
    r = np.zeros((H, H1), np.float32)
    r[dY0:dY0 + 2 * H1, :] = uh
    p = np.zeros((W1, W), np.float32)
    p[:, dX0:dX0 + 2 * W1] = uw.T
    return _block_diag(r, Bt), _block_diag(p, C1)


def _conv3x3_toeplitz(w, W):
    """w (3, 3, Ci, Co) -> T (3, Ci*W, Co*W): for a row stack X (N, Ci*W) in
    planar-folded layout (lane = ci*W + w), the 3x3 'same' conv is
        acc = shift_down(X) @ T[0] + X @ T[1] + shift_up(X) @ T[2]
    (the zero COLUMN padding is baked into T; ROW padding is the two shifts,
    so no 3x-wide operand is ever materialised)."""
    _, _, Ci, Co = w.shape
    WO, DX, CI, CO = np.meshgrid(np.arange(W), np.arange(3), np.arange(Ci),
                                 np.arange(Co), indexing="ij")
    WIN = WO + DX - 1                                    # input column of this tap
    valid = (WIN >= 0) & (WIN < W)
    rows = (CI * W + WIN)[valid]
    cols = (CO * W + WO)[valid]
    dxv, civ, cov = DX[valid], CI[valid], CO[valid]
    t = jnp.zeros((3, Ci * W, Co * W), jnp.float32)
    for dy in range(3):
        t = t.at[dy, rows, cols].set(w[dy][dxv, civ, cov])
    return t


# ----------------------------------- kernels -----------------------------------

def _partial_stats(acc):
    """(N, L) f32 -> (2, L): per-lane [sum, sum-of-squares] partials (f32)."""
    return jnp.concatenate([jnp.sum(acc, axis=0, keepdims=True),
                            jnp.sum(acc * acc, axis=0, keepdims=True)], axis=0)


def _conv3x3_rows(x, h, t_ref, b_ref):
    """x (Bt*h, Ci*W) planar folded (matmul compute dtype): 3x3 'same' conv as
    THREE MXU matmuls against the dy-slices of the block-Toeplitz weight.
    Row zero-padding == two shifted copies of x with the per-image boundary
    rows masked to zero (images are stacked every `h` rows)."""
    n, L = x.shape
    zero = jnp.zeros((), x.dtype)
    zrow = jnp.zeros((1, L), x.dtype)
    row = lax.broadcasted_iota(jnp.int32, (n, 1), 0)
    x_dn = jnp.where(row % h == 0, zero,
                     jnp.concatenate([zrow, x[:-1]], axis=0))      # input row y-1
    x_up = jnp.where(row % h == h - 1, zero,
                     jnp.concatenate([x[1:], zrow], axis=0))       # input row y+1
    acc = jnp.dot(x_dn, t_ref[0], preferred_element_type=jnp.float32)
    acc = acc + jnp.dot(x, t_ref[1], preferred_element_type=jnp.float32)
    acc = acc + jnp.dot(x_up, t_ref[2], preferred_element_type=jnp.float32)
    return acc + b_ref[...]


def _k1_prep_conv1(x2f_ref, x1f_ref, rb_ref, pb_ref, t1_ref, b1_ref,
                   acc_ref, st_ref, *, h):
    """Bt images per step: upsample + centre-pad x1 (two matmuls against the
    block-diagonal interp matrices), lane-concat with x2, conv1 as 3 matmuls,
    per-tile BN1 partial sums."""
    cdt = t1_ref.dtype
    x2r = x2f_ref[...]                                             # (Bt*H, C1*W)
    x1r = x1f_ref[...]                                             # (Bt*H1, C1*W1)
    # width interp + placement: one matmul vs block-diag P (per channel)
    x1w = jnp.dot(x1r, pb_ref[...], preferred_element_type=jnp.float32)
    # height interp + placement: one matmul vs block-diag R (per image)
    x1u = jnp.dot(rb_ref[...], x1w.astype(cdt),
                  preferred_element_type=jnp.float32)              # (Bt*H, C1*W)
    # torch.cat([x2, x1], dim=1): channel order == lane-group order
    x = jnp.concatenate([x2r, x1u.astype(cdt)], axis=1)            # (Bt*H, Cin*W)
    acc = _conv3x3_rows(x, h, t1_ref, b1_ref)                      # f32
    st_ref[0] = _partial_stats(acc)
    acc_ref[...] = acc.astype(acc_ref.dtype)


def _k2_bn1_conv2(a1_ref, s1_ref, t2_ref, b2_ref, acc_ref, st_ref, *, h):
    """Bt images per step: BN1(batch stats)+ReLU in f32, conv2 as 3 matmuls,
    per-tile BN2 partial sums."""
    a1 = a1_ref[...].astype(jnp.float32)
    h1 = jnp.maximum(a1 * s1_ref[0:1, :] + s1_ref[1:2, :], 0.0)
    acc = _conv3x3_rows(h1.astype(t2_ref.dtype), h, t2_ref, b2_ref)
    st_ref[0] = _partial_stats(acc)
    acc_ref[...] = acc.astype(acc_ref.dtype)


def _k3_bn2_adaption(a2_ref, p_ref, o_ref):
    """Lane-dense row-folded epilogue: BN2+ReLU + _SelfAdaption (grouped 1x1
    convs are per-channel scale/shift here) + residual add (lambda1 == 1).
    packed param rows: 0 scale2, 1 shift2, 2..5 wa1[k], 6..9 ba1[k],
                       10..13 wa2[k], 14 ba2   (tiled to the folded lanes)."""
    h2 = jnp.maximum(a2_ref[...].astype(jnp.float32) * p_ref[0:1, :]
                     + p_ref[1:2, :], 0.0)
    # relu1 of _SelfAdaption is a no-op (h2 is already post-ReLU)
    out = h2 + p_ref[14:15, :]
    for k in range(4):                                   # hidden_channels = 4
        t = jnp.maximum(h2 * p_ref[2 + k:3 + k, :] + p_ref[6 + k:7 + k, :], 0.0)
        out = out + t * p_ref[10 + k:11 + k, :]
    o_ref[...] = out.astype(o_ref.dtype)


# ----------------------------------- wrapper -----------------------------------

def _const_spec(shape):
    """BlockSpec for a grid-invariant input: constant index map and (when the
    installed JAX supports it) single-buffered so the weight is not held twice
    in VMEM (matters on v7x's 64 MiB VMEM)."""
    ndim = len(shape)
    idx = lambda *_: (0,) * ndim
    buffered = getattr(pl, "Buffered", None)
    if buffered is not None:
        try:
            return pl.BlockSpec(shape, idx, pipeline_mode=buffered(1))
        except TypeError:
            pass
    return pl.BlockSpec(shape, idx)


def _cost(flops, bytes_accessed):
    try:
        return pl.CostEstimate(flops=int(flops), transcendentals=0,
                               bytes_accessed=int(bytes_accessed))
    except Exception:                                    # pragma: no cover
        return None


def _pick_bt(B, H, target_m=128, min_steps=2):
    """Images per grid step: fill the conv matmul's M dimension (MXU rows) up
    to ~target_m, but avoid collapsing to a single grid step once M already
    reached target_m/min_steps (keeps the BlockSpec pipeline and v7x's second
    TensorCore busy)."""
    best = 1
    for bt in range(2, B + 1):
        if B % bt:
            continue
        if bt * H > target_m:
            break
        if B // bt >= min_steps or bt * H <= target_m // min_steps:
            best = bt
    return best


def _lane_fold(rows, lanes, max_fold=8):
    """Smallest f with (f*lanes) % 128 == 0 and rows % f == 0 (else 1): lets
    the elementwise epilogue run on a lane-dense (rows/f, f*lanes) view that
    is a free (bitcast) reshape of the conv output."""
    if lanes % 128 == 0:
        return 1
    for f in range(2, max_fold + 1):
        if rows % f == 0 and (f * lanes) % 128 == 0:
            return f
    return 1


def _pick_row_tile(rows, bytes_per_row, budget):
    """Largest VMEM-budgeted row tile for the epilogue (in+out, double
    buffered) that keeps an (8,128)-aligned or full-array block."""
    cap = max(8, int(budget) // max(int(bytes_per_row), 1))
    if rows <= cap:
        return rows                                      # full array: always legal
    best = None
    for d in range(8, cap + 1, 8):                       # multiples of 8 only
        if rows % d == 0:
            best = d
    if best is None:
        # TODO(synk): pad `rows` to a multiple of 8 when it has no suitable
        #             divisor; fall back to one full block for now.
        return rows
    return best


def _bn_scale_shift(st, gamma, beta, n, C, W):
    """st (G, 2, C*W) per-tile [sum, sumsq] -> fused BN scale/shift tiled to
    the planar-folded lanes.  Kept entirely in f32 (do NOT narrow the stats:
    E[x^2]-E[x]^2 is fine in f32 at these sizes; use a shifted/two-pass
    variance before scaling to very large B*H*W)."""
    s = st.sum(axis=0).reshape(2, C, W).sum(axis=-1)     # (2, C)
    mean = s[0] / n
    var = s[1] / n - mean * mean                         # biased var (train-mode BN)
    scale = gamma * lax.rsqrt(var + EPS)
    shift = beta - mean * scale
    return jnp.repeat(scale, W), jnp.repeat(shift, W)    # (C*W,) each


def up_forward(x1, x2, params, *, compute_dtype=jnp.bfloat16, layout="nchw",
               vmem_limit_bytes=64 * 1024 * 1024, target_m=128):
    """Forward pass of Up (bilinear=True).  x1 (B,C1,H1,W1) low-res input,
    x2 (B,C1,H,W) skip connection.  Returns NCHW (B,Cout,H,W) f32, or the
    lane-dense planar-folded (B,H,Cout*W) view when layout="folded" (skips
    one full-tensor HBM transpose for a folded-layout consumer)."""
    B, C1, H1, W1 = x1.shape
    Bb, C1b, H, W = x2.shape
    assert B == Bb and C1 == C1b
    assert H >= 2 * H1 and W >= 2 * W1
    Cin = 2 * C1
    Cmid = params["w1"].shape[3]
    Cout = params["w2"].shape[3]
    f32 = jnp.float32
    cdt = compute_dtype
    csize = jnp.dtype(cdt).itemsize
    L_in, L1, L2 = Cin * W, Cmid * W, Cout * W

    bt = _pick_bt(B, H, target_m=target_m)
    g = B // bt                                          # grid steps for K1/K2

    # ---- wrapper-side relayout + constants (one XLA pass each, lane-dense) ----
    # NCHW -> planar folded A[b*H + y, c*W + w]
    x2f = x2.transpose(0, 2, 1, 3).reshape(B * H, C1 * W).astype(cdt)
    x1f = x1.transpose(0, 2, 1, 3).reshape(B * H1, C1 * W1).astype(cdt)
    r_np, p_np = _upsample_place_matrices(H1, W1, H, W, C1, bt)
    r_big = jnp.asarray(r_np).astype(cdt)                # (bt*H, bt*H1)
    p_big = jnp.asarray(p_np).astype(cdt)                # (C1*W1, C1*W)
    t1 = _conv3x3_toeplitz(params["w1"], W).astype(cdt)  # (3, Cin*W,  Cmid*W)
    t2 = _conv3x3_toeplitz(params["w2"], W).astype(cdt)  # (3, Cmid*W, Cout*W)
    b1t = jnp.repeat(params["b1"], W)[None, :].astype(f32)   # (1, Cmid*W)
    b2t = jnp.repeat(params["b2"], W)[None, :].astype(f32)   # (1, Cout*W)

    cp = pltpu.CompilerParams(dimension_semantics=("parallel",),
                              vmem_limit_bytes=vmem_limit_bytes)

    # ---- K1: upsample + pad + concat + conv1 + BN1 partial stats ----
    conv1_flops = 2 * B * H * (3 * L_in) * L1
    ups_flops = (2 * B * H1 * (C1 * W1) * (C1 * W)
                 + 2 * B * H * (bt * H1) * (C1 * W))
    k1_bytes = ((x1f.size + x2f.size + t1.size + r_big.size + p_big.size) * csize
                + B * H * L1 * csize + g * 2 * L1 * 4)
    acc1, st1 = pl.pallas_call(
        functools.partial(_k1_prep_conv1, h=H),
        out_shape=(jax.ShapeDtypeStruct((B * H, L1), cdt),
                   jax.ShapeDtypeStruct((g, 2, L1), f32)),
        grid=(g,),
        in_specs=[
            pl.BlockSpec((bt * H, C1 * W), lambda b: (b, 0)),
            pl.BlockSpec((bt * H1, C1 * W1), lambda b: (b, 0)),
            _const_spec(r_big.shape),
            _const_spec(p_big.shape),
            _const_spec(t1.shape),
            _const_spec(b1t.shape),
        ],
        out_specs=(pl.BlockSpec((bt * H, L1), lambda b: (b, 0)),
                   pl.BlockSpec((1, 2, L1), lambda b: (b, 0, 0))),
        compiler_params=cp,
        cost_estimate=_cost(conv1_flops + ups_flops, k1_bytes),
    )(x2f, x1f, r_big, p_big, t1, b1t)

    s1, sh1 = _bn_scale_shift(st1, params["g1"], params["be1"], B * H * W, Cmid, W)
    sc1 = jnp.stack([s1, sh1], axis=0)                   # (2, Cmid*W) f32

    # ---- K2: BN1+ReLU + conv2 + BN2 partial stats ----
    conv2_flops = 2 * B * H * (3 * L1) * L2
    k2_bytes = (B * H * L1 * csize + t2.size * csize
                + B * H * L2 * csize + g * 2 * L2 * 4)
    acc2, st2 = pl.pallas_call(
        functools.partial(_k2_bn1_conv2, h=H),
        out_shape=(jax.ShapeDtypeStruct((B * H, L2), cdt),
                   jax.ShapeDtypeStruct((g, 2, L2), f32)),
        grid=(g,),
        in_specs=[
            pl.BlockSpec((bt * H, L1), lambda b: (b, 0)),
            _const_spec(sc1.shape),
            _const_spec(t2.shape),
            _const_spec(b2t.shape),
        ],
        out_specs=(pl.BlockSpec((bt * H, L2), lambda b: (b, 0)),
                   pl.BlockSpec((1, 2, L2), lambda b: (b, 0, 0))),
        compiler_params=cp,
        cost_estimate=_cost(conv2_flops, k2_bytes),
    )(acc1, sc1, t2, b2t)

    s2, sh2 = _bn_scale_shift(st2, params["g2"], params["be2"], B * H * W, Cout, W)

    # all epilogue per-channel params packed into ONE small f32 array
    p3 = jnp.concatenate(
        [s2[None, :], sh2[None, :],
         jnp.repeat(params["wa1"], W, axis=1),
         jnp.repeat(params["ba1"], W, axis=1),
         jnp.repeat(params["wa2"], W, axis=1),
         jnp.repeat(params["ba2"], W)[None, :]], axis=0).astype(f32)  # (15, L2)

    # ---- K3: BN2+ReLU + _SelfAdaption + residual, lane-dense row-folded ----
    rows = B * H
    f = _lane_fold(rows, L2)
    rows_f = rows // f
    a2_rows = acc2.reshape(rows_f, f * L2)               # free reshape (bitcast)
    p3f = jnp.tile(p3, (1, f))                           # (15, f*L2)
    bytes_per_row = 2 * f * L2 * (csize + 4)             # dbl-buffered in + out
    tr = _pick_row_tile(rows_f, bytes_per_row,
                        min(vmem_limit_bytes, 48 << 20) // 2)
    k3_bytes = rows * L2 * (csize + 4) + p3f.size * 4
    out_rows = pl.pallas_call(
        _k3_bn2_adaption,
        out_shape=jax.ShapeDtypeStruct((rows_f, f * L2), f32),
        grid=(rows_f // tr,),
        in_specs=[pl.BlockSpec((tr, f * L2), lambda i: (i, 0)),
                  _const_spec(p3f.shape)],
        out_specs=pl.BlockSpec((tr, f * L2), lambda i: (i, 0)),
        compiler_params=cp,
        cost_estimate=_cost(rows * L2 * 20, k3_bytes),
    )(a2_rows, p3f)

    out_folded = out_rows.reshape(B, H, L2)              # free reshape (bitcast)
    if layout == "folded":
        return out_folded                                # lane-dense A[b, y, c*W+w]
    # module interface: NCHW (one XLA transpose; pass layout="folded" to skip)
    return out_folded.reshape(B, H, Cout, W).transpose(0, 2, 1, 3)


# ------------------------------ parameters & reference ------------------------------

def make_up_params(key, in_channels, out_channels):
    mid = in_channels // 2
    ks = jax.random.split(key, 12)

    def rnd(k, shape, scale=0.1):
        return (scale * jax.random.normal(k, shape)).astype(jnp.float32)

    return dict(
        # Conv2d(in, mid, 3, pad=1) weights as (kh, kw, Cin, Cout); Cin axis is
        # ordered [x2 channels, x1 channels] == torch.cat([x2, x1], dim=1).
        w1=rnd(ks[0], (3, 3, in_channels, mid)), b1=rnd(ks[1], (mid,)),
        g1=1.0 + rnd(ks[2], (mid,)), be1=rnd(ks[3], (mid,)),
        # Conv2d(mid, out, 3, pad=1)
        w2=rnd(ks[4], (3, 3, mid, out_channels)), b2=rnd(ks[5], (out_channels,)),
        g2=1.0 + rnd(ks[6], (out_channels,)), be2=rnd(ks[7], (out_channels,)),
        # _SelfAdaption grouped 1x1 convs: wa1[k, c] == convs1.weight[4*c+k,0,0,0]
        wa1=rnd(ks[8], (4, out_channels)), ba1=rnd(ks[9], (4, out_channels)),
        # wa2[k, c] == convs3.weight[c, k, 0, 0],  ba2[c] == convs3.bias[c]
        wa2=rnd(ks[10], (4, out_channels)), ba2=rnd(ks[11], (out_channels,)),
    )


def _reference_forward(x1, x2, params):
    """Pure-JAX (XLA) reference of Up.forward for the self-check."""
    B, C1, H1, W1 = x1.shape
    H, W = x2.shape[2], x2.shape[3]
    uh = jnp.asarray(_bilinear_matrix(H1, 2 * H1))
    uw = jnp.asarray(_bilinear_matrix(W1, 2 * W1))
    x1u = jnp.einsum("oh,bchw->bcow", uh, x1)
    x1u = jnp.einsum("bcow,vw->bcov", x1u, uw)
    dY, dX = H - 2 * H1, W - 2 * W1
    x1u = jnp.pad(x1u, ((0, 0), (0, 0),
                        (dY // 2, dY - dY // 2), (dX // 2, dX - dX // 2)))
    x = jnp.concatenate([x2, x1u], axis=1)

    def conv3(z, w, b):
        y = lax.conv_general_dilated(z, w, (1, 1), ((1, 1), (1, 1)),
                                     dimension_numbers=("NCHW", "HWIO", "NCHW"))
        return y + b.reshape(1, -1, 1, 1)

    def bn_relu(y, gmm, be):
        m = y.mean(axis=(0, 2, 3), keepdims=True)
        v = ((y - m) ** 2).mean(axis=(0, 2, 3), keepdims=True)
        return jax.nn.relu((y - m) * lax.rsqrt(v + EPS)
                           * gmm.reshape(1, -1, 1, 1) + be.reshape(1, -1, 1, 1))

    h1 = bn_relu(conv3(x, params["w1"], params["b1"]), params["g1"], params["be1"])
    h2 = bn_relu(conv3(h1, params["w2"], params["b2"]), params["g2"], params["be2"])
    adp = params["ba2"].reshape(1, -1, 1, 1)
    for k in range(4):
        t = jax.nn.relu(h2 * params["wa1"][k].reshape(1, -1, 1, 1)
                        + params["ba1"][k].reshape(1, -1, 1, 1))
        adp = adp + t * params["wa2"][k].reshape(1, -1, 1, 1)
    return h2 + adp


if __name__ == "__main__":
    key = jax.random.PRNGKey(0)
    k1, k2, kp = jax.random.split(key, 3)

    B = 2
    in_channels, out_channels = 8, 4                     # Up(8, 4, bilinear=True)
    x1 = jax.random.normal(k1, (B, in_channels // 2, 8, 8), jnp.float32)
    x2 = jax.random.normal(k2, (B, in_channels // 2, 16, 16), jnp.float32)
    params = make_up_params(kp, in_channels, out_channels)

    ref = jax.block_until_ready(_reference_forward(x1, x2, params))

    # default path: bf16 intermediates/weights, f32 accumulation + BN stats
    up_bf16 = jax.jit(functools.partial(up_forward, compute_dtype=jnp.bfloat16))
    out = jax.block_until_ready(up_bf16(x1, x2, params))
    assert out.shape == (B, out_channels, 16, 16), out.shape
    assert bool(jnp.all(jnp.isfinite(out)))
    # bf16 storage of the two conv activations gives ~1e-2-scale max-abs error
    assert float(jnp.max(jnp.abs(out - ref))) < 1e-1

    # f32 path: tight check that the kernel math matches the reference exactly
    up_f32 = jax.jit(functools.partial(up_forward, compute_dtype=jnp.float32))
    out32 = jax.block_until_ready(up_f32(x1, x2, params))
    assert float(jnp.max(jnp.abs(out32 - ref))) < 2e-3

    print("KERNEL_OK")
</pallas_src>

<mosaic_0001>
module attributes {stable_mosaic.version = 11 : i64} {
  func.func @_k1_prep_conv1(%arg0: i32, %arg1: memref<32x64xbf16, #tpu.memory_space<vmem>>, %arg2: memref<16x32xbf16, #tpu.memory_space<vmem>>, %arg3: memref<32x16xbf16, #tpu.memory_space<vmem>>, %arg4: memref<32x64xbf16, #tpu.memory_space<vmem>>, %arg5: memref<3x128x64xbf16, #tpu.memory_space<vmem>>, %arg6: memref<1x64xf32, #tpu.memory_space<vmem>>, %arg7: memref<32x64xbf16, #tpu.memory_space<vmem>>, %arg8: memref<1x2x64xf32, #tpu.memory_space<vmem>>) attributes {dimension_semantics = [#tpu.dimension_semantics<parallel>], iteration_bounds = array<i64: 1>, scalar_prefetch = 0 : i64, scratch_operands = 0 : i64, tpu.core_type = #tpu.core_type<tc>, window_params = [{transform_indices = @transform_0, window_bounds = array<i64: 32, 64>}, {transform_indices = @transform_1, window_bounds = array<i64: 16, 32>}, {pipeline_mode = #tpu.pipeline_mode<synchronous>, transform_indices = @transform_2, window_bounds = array<i64: 32, 16>}, {pipeline_mode = #tpu.pipeline_mode<synchronous>, transform_indices = @transform_3, window_bounds = array<i64: 32, 64>}, {pipeline_mode = #tpu.pipeline_mode<synchronous>, transform_indices = @transform_4, window_bounds = array<i64: 3, 128, 64>}, {pipeline_mode = #tpu.pipeline_mode<synchronous>, transform_indices = @transform_5, window_bounds = array<i64: 1, 64>}, {transform_indices = @transform_6, window_bounds = array<i64: 32, 64>}, {transform_indices = @transform_7, window_bounds = array<i64: 1, 2, 64>}]} {
    %c0 = arith.constant 0 : index
    %c0_0 = arith.constant 0 : index
    %0 = vector.load %arg1[%c0, %c0_0] : memref<32x64xbf16, #tpu.memory_space<vmem>>, vector<32x64xbf16>
    %c0_1 = arith.constant 0 : index
    %c0_2 = arith.constant 0 : index
    %1 = vector.load %arg2[%c0_1, %c0_2] : memref<16x32xbf16, #tpu.memory_space<vmem>>, vector<16x32xbf16>
    %c0_3 = arith.constant 0 : index
    %c0_4 = arith.constant 0 : index
    %2 = vector.load %arg4[%c0_3, %c0_4] : memref<32x64xbf16, #tpu.memory_space<vmem>>, vector<32x64xbf16>
    %cst = arith.constant dense<0.000000e+00> : vector<16x64xf32>
    %3 = tpu.matmul %1, %2, %cst {dimension_numbers = #tpu.dot_dimension_numbers<[1], [0], [0], [1], [0, 0, 1, 1], [], []>} : vector<16x32xbf16>, vector<32x64xbf16>, vector<16x64xf32> -> vector<16x64xf32>
    %c0_5 = arith.constant 0 : index
    %c0_6 = arith.constant 0 : index
    %4 = vector.load %arg3[%c0_5, %c0_6] : memref<32x16xbf16, #tpu.memory_space<vmem>>, vector<32x16xbf16>
    %5 = arith.truncf %3 : vector<16x64xf32> to vector<16x64xbf16>
    %cst_7 = arith.constant dense<0.000000e+00> : vector<32x64xf32>
    %6 = tpu.matmul %4, %5, %cst_7 {dimension_numbers = #tpu.dot_dimension_numbers<[1], [0], [0], [1], [0, 0, 1, 1], [], []>} : vector<32x16xbf16>, vector<16x64xbf16>, vector<32x64xf32> -> vector<32x64xf32>
    %7 = arith.truncf %6 : vector<32x64xf32> to vector<32x64xbf16>
    %8 = tpu.concatenate %0, %7 in 1 : vector<32x64xbf16>, vector<32x64xbf16> -> vector<32x128xbf16>
    %cst_8 = arith.constant 0.000000e+00 : bf16
    %9 = vector.broadcast %cst_8 : bf16 to vector<1x128xbf16>
    %10 = tpu.iota {dimensions = array<i32: 0>} : vector<32x1xi32>
    %c16_i32 = arith.constant 16 : i32
    %c0_i32 = arith.constant 0 : i32
    %11 = arith.cmpi eq, %c16_i32, %c0_i32 : i32
    %c1_i32 = arith.constant 1 : i32
    %12 = arith.select %11, %c1_i32, %c16_i32 : i32
    %13 = vector.broadcast %12 : i32 to vector<32x1xi32>
    %14 = arith.remsi %10, %13 : vector<32x1xi32>
    %c0_i32_9 = arith.constant 0 : i32
    %15 = vector.broadcast %c0_i32_9 : i32 to vector<32x1xi32>
    %16 = arith.cmpi ne, %14, %15 : vector<32x1xi32>
    %c0_i32_10 = arith.constant 0 : i32
    %17 = vector.broadcast %c0_i32_10 : i32 to vector<32x1xi32>
    %18 = arith.cmpi slt, %14, %17 : vector<32x1xi32>
    %c0_i32_11 = arith.constant 0 : i32
    %19 = arith.cmpi slt, %12, %c0_i32_11 : i32
    %20 = vector.broadcast %19 : i1 to vector<32x1xi1>
    %21 = vector.broadcast %20 : vector<32x1xi1> to vector<32x1xi1>
    %22 = arith.xori %18, %21 : vector<32x1xi1>
    %23 = arith.andi %22, %16 : vector<32x1xi1>
    %24 = vector.broadcast %12 : i32 to vector<32x1xi32>
    %25 = arith.addi %14, %24 : vector<32x1xi32>
    %26 = arith.select %23, %25, %14 : vector<32x1xi1>, vector<32x1xi32>
    %c0_i32_12 = arith.constant 0 : i32
    %27 = vector.broadcast %c0_i32_12 : i32 to vector<32x1xi32>
    %28 = arith.cmpi eq, %26, %27 : vector<32x1xi32>
    %29 = vector.extract_strided_slice %8 {offsets = [0, 0], sizes = [31, 128], strides = [1, 1]} : vector<32x128xbf16> to vector<31x128xbf16>
    %30 = tpu.concatenate %9, %29 in 0 : vector<1x128xbf16>, vector<31x128xbf16> -> vector<32x128xbf16>
    %cst_13 = arith.constant 0.000000e+00 : bf16
    %31 = vector.shape_cast %28 : vector<32x1xi1> to vector<32x1xi1>
    %32 = vector.broadcast %31 : vector<32x1xi1> to vector<32x128xi1>
    %33 = vector.broadcast %cst_13 : bf16 to vector<32x128xbf16>
    %34 = arith.select %32, %33, %30 : vector<32x128xi1>, vector<32x128xbf16>
    %c16_i32_14 = arith.constant 16 : i32
    %c0_i32_15 = arith.constant 0 : i32
    %35 = arith.cmpi eq, %c16_i32_14, %c0_i32_15 : i32
    %c1_i32_16 = arith.constant 1 : i32
    %36 = arith.select %35, %c1_i32_16, %c16_i32_14 : i32
    %37 = vector.broadcast %36 : i32 to vector<32x1xi32>
    %38 = arith.remsi %10, %37 : vector<32x1xi32>
    %c0_i32_17 = arith.constant 0 : i32
    %39 = vector.broadcast %c0_i32_17 : i32 to vector<32x1xi32>
    %40 = arith.cmpi ne, %38, %39 : vector<32x1xi32>
    %c0_i32_18 = arith.constant 0 : i32
    %41 = vector.broadcast %c0_i32_18 : i32 to vector<32x1xi32>
    %42 = arith.cmpi slt, %38, %41 : vector<32x1xi32>
    %c0_i32_19 = arith.constant 0 : i32
    %43 = arith.cmpi slt, %36, %c0_i32_19 : i32
    %44 = vector.broadcast %43 : i1 to vector<32x1xi1>
    %45 = vector.broadcast %44 : vector<32x1xi1> to vector<32x1xi1>
    %46 = arith.xori %42, %45 : vector<32x1xi1>
    %47 = arith.andi %46, %40 : vector<32x1xi1>
    %48 = vector.broadcast %36 : i32 to vector<32x1xi32>
    %49 = arith.addi %38, %48 : vector<32x1xi32>
    %50 = arith.select %47, %49, %38 : vector<32x1xi1>, vector<32x1xi32>
    %c15_i32 = arith.constant 15 : i32
    %51 = vector.broadcast %c15_i32 : i32 to vector<32x1xi32>
    %52 = arith.cmpi eq, %50, %51 : vector<32x1xi32>
    %53 = vector.extract_strided_slice %8 {offsets = [1, 0], sizes = [31, 128], strides = [1, 1]} : vector<32x128xbf16> to vector<31x128xbf16>
    %54 = tpu.concatenate %53, %9 in 0 : vector<31x128xbf16>, vector<1x128xbf16> -> vector<32x128xbf16>
    %cst_20 = arith.constant 0.000000e+00 : bf16
    %55 = vector.shape_cast %52 : vector<32x1xi1> to vector<32x1xi1>
    %56 = vector.broadcast %55 : vector<32x1xi1> to vector<32x128xi1>
    %57 = vector.broadcast %cst_20 : bf16 to vector<32x128xbf16>
    %58 = arith.select %56, %57, %54 : vector<32x128xi1>, vector<32x128xbf16>
    %c0_21 = arith.constant 0 : index
    %c0_22 = arith.constant 0 : index
    %c0_23 = arith.constant 0 : index
    %59 = vector.load %arg5[%c0_21, %c0_22, %c0_23] : memref<3x128x64xbf16, #tpu.memory_space<vmem>>, vector<1x128x64xbf16>
    %60 = vector.shape_cast %59 : vector<1x128x64xbf16> to vector<128x64xbf16>
    %cst_24 = arith.constant dense<0.000000e+00> : vector<32x64xf32>
    %61 = tpu.matmul %34, %60, %cst_24 {dimension_numbers = #tpu.dot_dimension_numbers<[1], [0], [0], [1], [0, 0, 1, 1], [], []>} : vector<32x128xbf16>, vector<128x64xbf16>, vector<32x64xf32> -> vector<32x64xf32>
    %c1 = arith.constant 1 : index
    %c0_25 = arith.constant 0 : index
    %c0_26 = arith.constant 0 : index
    %62 = vector.load %arg5[%c1, %c0_25, %c0_26] : memref<3x128x64xbf16, #tpu.memory_space<vmem>>, vector<1x128x64xbf16>
    %63 = vector.shape_cast %62 : vector<1x128x64xbf16> to vector<128x64xbf16>
    %cst_27 = arith.constant dense<0.000000e+00> : vector<32x64xf32>
    %64 = tpu.matmul %8, %63, %cst_27 {dimension_numbers = #tpu.dot_dimension_numbers<[1], [0], [0], [1], [0, 0, 1, 1], [], []>} : vector<32x128xbf16>, vector<128x64xbf16>, vector<32x64xf32> -> vector<32x64xf32>
    %65 = arith.addf %61, %64 : vector<32x64xf32>
    %c2 = arith.constant 2 : index
    %c0_28 = arith.constant 0 : index
    %c0_29 = arith.constant 0 : index
    %66 = vector.load %arg5[%c2, %c0_28, %c0_29] : memref<3x128x64xbf16, #tpu.memory_space<vmem>>, vector<1x128x64xbf16>
    %67 = vector.shape_cast %66 : vector<1x128x64xbf16> to vector<128x64xbf16>
    %cst_30 = arith.constant dense<0.000000e+00> : vector<32x64xf32>
    %68 = tpu.matmul %58, %67, %cst_30 {dimension_numbers = #tpu.dot_dimension_numbers<[1], [0], [0], [1], [0, 0, 1, 1], [], []>} : vector<32x128xbf16>, vector<128x64xbf16>, vector<32x64xf32> -> vector<32x64xf32>
    %69 = arith.addf %65, %68 : vector<32x64xf32>
    %c0_31 = arith.constant 0 : index
    %c0_32 = arith.constant 0 : index
    %70 = vector.load %arg6[%c0_31, %c0_32] : memref<1x64xf32, #tpu.memory_space<vmem>>, vector<1x64xf32>
    %71 = vector.broadcast %70 : vector<1x64xf32> to vector<32x64xf32>
    %72 = arith.addf %69, %71 : vector<32x64xf32>
    %cst_33 = arith.constant dense<0.000000e+00> : vector<64xf32>
    %73 = vector.multi_reduction <add>, %72, %cst_33 [0] : vector<32x64xf32> to vector<64xf32>
    %74 = vector.shape_cast %73 : vector<64xf32> to vector<1x64xf32>
    %75 = arith.mulf %72, %72 : vector<32x64xf32>
    %cst_34 = arith.constant dense<0.000000e+00> : vector<64xf32>
    %76 = vector.multi_reduction <add>, %75, %cst_34 [0] : vector<32x64xf32> to vector<64xf32>
    %77 = vector.shape_cast %76 : vector<64xf32> to vector<1x64xf32>
    %78 = tpu.concatenate %74, %77 in 0 : vector<1x64xf32>, vector<1x64xf32> -> vector<2x64xf32>
    %c0_35 = arith.constant 0 : index
    %c0_36 = arith.constant 0 : index
    %c0_37 = arith.constant 0 : index
    %79 = vector.load %arg8[%c0_35, %c0_36, %c0_37] : memref<1x2x64xf32, #tpu.memory_space<vmem>>, vector<1x2x64xf32>
    %80 = vector.shape_cast %79 : vector<1x2x64xf32> to vector<2x64xf32>
    %81 = vector.shape_cast %78 : vector<2x64xf32> to vector<1x2x64xf32>
    tpu.vector_store %arg8[%c0_35, %c0_36, %c0_37], %81 {strides = array<i32>} : memref<1x2x64xf32, #tpu.memory_space<vmem>>, vector<1x2x64xf32>,
    %82 = arith.truncf %72 : vector<32x64xf32> to vector<32x64xbf16>
    %c0_38 = arith.constant 0 : index
    %c0_39 = arith.constant 0 : index
    %83 = vector.load %arg7[%c0_38, %c0_39] : memref<32x64xbf16, #tpu.memory_space<vmem>>, vector<32x64xbf16>
    tpu.vector_store %arg7[%c0_38, %c0_39], %82 {strides = array<i32>} : memref<32x64xbf16, #tpu.memory_space<vmem>>, vector<32x64xbf16>,
    return
  }
  func.func @transform_0(%arg0: i32) -> (i32, i32) {
    %c0_i32 = arith.constant 0 : i32
    %c0_i32_0 = arith.constant 0 : i32
    return %arg0, %c0_i32 : i32, i32
  }
  func.func @transform_1(%arg0: i32) -> (i32, i32) {
    %c0_i32 = arith.constant 0 : i32
    %c0_i32_0 = arith.constant 0 : i32
    return %arg0, %c0_i32 : i32, i32
  }
  func.func @transform_2(%arg0: i32) -> (i32, i32) {
    %c0_i32 = arith.constant 0 : i32
    %c0_i32_0 = arith.constant 0 : i32
    %c0_i32_1 = arith.constant 0 : i32
    return %c0_i32, %c0_i32_0 : i32, i32
  }
  func.func @transform_3(%arg0: i32) -> (i32, i32) {
    %c0_i32 = arith.constant 0 : i32
    %c0_i32_0 = arith.constant 0 : i32
    %c0_i32_1 = arith.constant 0 : i32
    return %c0_i32, %c0_i32_0 : i32, i32
  }
  func.func @transform_4(%arg0: i32) -> (i32, i32, i32) {
    %c0_i32 = arith.constant 0 : i32
    %c0_i32_0 = arith.constant 0 : i32
    %c0_i32_1 = arith.constant 0 : i32
    %c0_i32_2 = arith.constant 0 : i32
    return %c0_i32, %c0_i32_0, %c0_i32_1 : i32, i32, i32
  }
  func.func @transform_5(%arg0: i32) -> (i32, i32) {
    %c0_i32 = arith.constant 0 : i32
    %c0_i32_0 = arith.constant 0 : i32
    %c0_i32_1 = arith.constant 0 : i32
    return %c0_i32, %c0_i32_0 : i32, i32
  }
  func.func @transform_6(%arg0: i32) -> (i32, i32) {
    %c0_i32 = arith.constant 0 : i32
    %c0_i32_0 = arith.constant 0 : i32
    return %arg0, %c0_i32 : i32, i32
  }
  func.func @transform_7(%arg0: i32) -> (i32, i32, i32) {
    %c0_i32 = arith.constant 0 : i32
    %c0_i32_0 = arith.constant 0 : i32
    %c0_i32_1 = arith.constant 0 : i32
    return %arg0, %c0_i32, %c0_i32_0 : i32, i32, i32
  }
}

module attributes {stable_mosaic.version = 11 : i64} {
  func.func @_k2_bn1_conv2(%arg0: i32, %arg1: memref<32x64xbf16, #tpu.memory_space<vmem>>, %arg2: memref<2x64xf32, #tpu.memory_space<vmem>>, %arg3: memref<3x64x64xbf16, #tpu.memory_space<vmem>>, %arg4: memref<1x64xf32, #tpu.memory_space<vmem>>, %arg5: memref<32x64xbf16, #tpu.memory_space<vmem>>, %arg6: memref<1x2x64xf32, #tpu.memory_space<vmem>>) attributes {dimension_semantics = [#tpu.dimension_semantics<parallel>], iteration_bounds = array<i64: 1>, scalar_prefetch = 0 : i64, scratch_operands = 0 : i64, tpu.core_type = #tpu.core_type<tc>, window_params = [{transform_indices = @transform_0, window_bounds = array<i64: 32, 64>}, {pipeline_mode = #tpu.pipeline_mode<synchronous>, transform_indices = @transform_1, window_bounds = array<i64: 2, 64>}, {pipeline_mode = #tpu.pipeline_mode<synchronous>, transform_indices = @transform_2, window_bounds = array<i64: 3, 64, 64>}, {pipeline_mode = #tpu.pipeline_mode<synchronous>, transform_indices = @transform_3, window_bounds = array<i64: 1, 64>}, {transform_indices = @transform_4, window_bounds = array<i64: 32, 64>}, {transform_indices = @transform_5, window_bounds = array<i64: 1, 2, 64>}]} {
    %c0 = arith.constant 0 : index
    %c0_0 = arith.constant 0 : index
    %0 = vector.load %arg1[%c0, %c0_0] : memref<32x64xbf16, #tpu.memory_space<vmem>>, vector<32x64xbf16>
    %1 = arith.extf %0 : vector<32x64xbf16> to vector<32x64xf32>
    %c0_1 = arith.constant 0 : index
    %c0_2 = arith.constant 0 : index
    %2 = vector.load %arg2[%c0_1, %c0_2] : memref<2x64xf32, #tpu.memory_space<vmem>>, vector<1x64xf32>
    %3 = vector.broadcast %2 : vector<1x64xf32> to vector<32x64xf32>
    %4 = arith.mulf %1, %3 : vector<32x64xf32>
    %c1 = arith.constant 1 : index
    %c0_3 = arith.constant 0 : index
    %5 = vector.load %arg2[%c1, %c0_3] : memref<2x64xf32, #tpu.memory_space<vmem>>, vector<1x64xf32>
    %6 = vector.broadcast %5 : vector<1x64xf32> to vector<32x64xf32>
    %7 = arith.addf %4, %6 : vector<32x64xf32>
    %cst = arith.constant 0.000000e+00 : f32
    %8 = vector.broadcast %cst : f32 to vector<32x64xf32>
    %9 = arith.maximumf %7, %8 : vector<32x64xf32>
    %10 = arith.truncf %9 : vector<32x64xf32> to vector<32x64xbf16>
    %cst_4 = arith.constant 0.000000e+00 : bf16
    %11 = vector.broadcast %cst_4 : bf16 to vector<1x64xbf16>
    %12 = tpu.iota {dimensions = array<i32: 0>} : vector<32x1xi32>
    %c16_i32 = arith.constant 16 : i32
    %c0_i32 = arith.constant 0 : i32
    %13 = arith.cmpi eq, %c16_i32, %c0_i32 : i32
    %c1_i32 = arith.constant 1 : i32
    %14 = arith.select %13, %c1_i32, %c16_i32 : i32
    %15 = vector.broadcast %14 : i32 to vector<32x1xi32>
    %16 = arith.remsi %12, %15 : vector<32x1xi32>
    %c0_i32_5 = arith.constant 0 : i32
    %17 = vector.broadcast %c0_i32_5 : i32 to vector<32x1xi32>
    %18 = arith.cmpi ne, %16, %17 : vector<32x1xi32>
    %c0_i32_6 = arith.constant 0 : i32
    %19 = vector.broadcast %c0_i32_6 : i32 to vector<32x1xi32>
    %20 = arith.cmpi slt, %16, %19 : vector<32x1xi32>
    %c0_i32_7 = arith.constant 0 : i32
    %21 = arith.cmpi slt, %14, %c0_i32_7 : i32
    %22 = vector.broadcast %21 : i1 to vector<32x1xi1>
    %23 = vector.broadcast %22 : vector<32x1xi1> to vector<32x1xi1>
    %24 = arith.xori %20, %23 : vector<32x1xi1>
    %25 = arith.andi %24, %18 : vector<32x1xi1>
    %26 = vector.broadcast %14 : i32 to vector<32x1xi32>
    %27 = arith.addi %16, %26 : vector<32x1xi32>
    %28 = arith.select %25, %27, %16 : vector<32x1xi1>, vector<32x1xi32>
    %c0_i32_8 = arith.constant 0 : i32
    %29 = vector.broadcast %c0_i32_8 : i32 to vector<32x1xi32>
    %30 = arith.cmpi eq, %28, %29 : vector<32x1xi32>
    %31 = vector.extract_strided_slice %10 {offsets = [0, 0], sizes = [31, 64], strides = [1, 1]} : vector<32x64xbf16> to vector<31x64xbf16>
    %32 = tpu.concatenate %11, %31 in 0 : vector<1x64xbf16>, vector<31x64xbf16> -> vector<32x64xbf16>
    %cst_9 = arith.constant 0.000000e+00 : bf16
    %33 = vector.shape_cast %30 : vector<32x1xi1> to vector<32x1xi1>
    %34 = vector.broadcast %33 : vector<32x1xi1> to vector<32x64xi1>
    %35 = vector.broadcast %cst_9 : bf16 to vector<32x64xbf16>
    %36 = arith.select %34, %35, %32 : vector<32x64xi1>, vector<32x64xbf16>
    %c16_i32_10 = arith.constant 16 : i32
    %c0_i32_11 = arith.constant 0 : i32
    %37 = arith.cmpi eq, %c16_i32_10, %c0_i32_11 : i32
    %c1_i32_12 = arith.constant 1 : i32
    %38 = arith.select %37, %c1_i32_12, %c16_i32_10 : i32
    %39 = vector.broadcast %38 : i32 to vector<32x1xi32>
    %40 = arith.remsi %12, %39 : vector<32x1xi32>
    %c0_i32_13 = arith.constant 0 : i32
    %41 = vector.broadcast %c0_i32_13 : i32 to vector<32x1xi32>
    %42 = arith.cmpi ne, %40, %41 : vector<32x1xi32>
    %c0_i32_14 = arith.constant 0 : i32
    %43 = vector.broadcast %c0_i32_14 : i32 to vector<32x1xi32>
    %44 = arith.cmpi slt, %40, %43 : vector<32x1xi32>
    %c0_i32_15 = arith.constant 0 : i32
    %45 = arith.cmpi slt, %38, %c0_i32_15 : i32
    %46 = vector.broadcast %45 : i1 to vector<32x1xi1>
    %47 = vector.broadcast %46 : vector<32x1xi1> to vector<32x1xi1>
    %48 = arith.xori %44, %47 : vector<32x1xi1>
    %49 = arith.andi %48, %42 : vector<32x1xi1>
    %50 = vector.broadcast %38 : i32 to vector<32x1xi32>
    %51 = arith.addi %40, %50 : vector<32x1xi32>
    %52 = arith.select %49, %51, %40 : vector<32x1xi1>, vector<32x1xi32>
    %c15_i32 = arith.constant 15 : i32
    %53 = vector.broadcast %c15_i32 : i32 to vector<32x1xi32>
    %54 = arith.cmpi eq, %52, %53 : vector<32x1xi32>
    %55 = vector.extract_strided_slice %10 {offsets = [1, 0], sizes = [31, 64], strides = [1, 1]} : vector<32x64xbf16> to vector<31x64xbf16>
    %56 = tpu.concatenate %55, %11 in 0 : vector<31x64xbf16>, vector<1x64xbf16> -> vector<32x64xbf16>
    %cst_16 = arith.constant 0.000000e+00 : bf16
    %57 = vector.shape_cast %54 : vector<32x1xi1> to vector<32x1xi1>
    %58 = vector.broadcast %57 : vector<32x1xi1> to vector<32x64xi1>
    %59 = vector.broadcast %cst_16 : bf16 to vector<32x64xbf16>
    %60 = arith.select %58, %59, %56 : vector<32x64xi1>, vector<32x64xbf16>
    %c0_17 = arith.constant 0 : index
    %c0_18 = arith.constant 0 : index
    %c0_19 = arith.constant 0 : index
    %61 = vector.load %arg3[%c0_17, %c0_18, %c0_19] : memref<3x64x64xbf16, #tpu.memory_space<vmem>>, vector<1x64x64xbf16>
    %62 = vector.shape_cast %61 : vector<1x64x64xbf16> to vector<64x64xbf16>
    %cst_20 = arith.constant dense<0.000000e+00> : vector<32x64xf32>
    %63 = tpu.matmul %36, %62, %cst_20 {dimension_numbers = #tpu.dot_dimension_numbers<[1], [0], [0], [1], [0, 0, 1, 1], [], []>} : vector<32x64xbf16>, vector<64x64xbf16>, vector<32x64xf32> -> vector<32x64xf32>
    %c1_21 = arith.constant 1 : index
    %c0_22 = arith.constant 0 : index
    %c0_23 = arith.constant 0 : index
    %64 = vector.load %arg3[%c1_21, %c0_22, %c0_23] : memref<3x64x64xbf16, #tpu.memory_space<vmem>>, vector<1x64x64xbf16>
    %65 = vector.shape_cast %64 : vector<1x64x64xbf16> to vector<64x64xbf16>
    %cst_24 = arith.constant dense<0.000000e+00> : vector<32x64xf32>
    %66 = tpu.matmul %10, %65, %cst_24 {dimension_numbers = #tpu.dot_dimension_numbers<[1], [0], [0], [1], [0, 0, 1, 1], [], []>} : vector<32x64xbf16>, vector<64x64xbf16>, vector<32x64xf32> -> vector<32x64xf32>
    %67 = arith.addf %63, %66 : vector<32x64xf32>
    %c2 = arith.constant 2 : index
    %c0_25 = arith.constant 0 : index
    %c0_26 = arith.constant 0 : index
    %68 = vector.load %arg3[%c2, %c0_25, %c0_26] : memref<3x64x64xbf16, #tpu.memory_space<vmem>>, vector<1x64x64xbf16>
    %69 = vector.shape_cast %68 : vector<1x64x64xbf16> to vector<64x64xbf16>
    %cst_27 = arith.constant dense<0.000000e+00> : vector<32x64xf32>
    %70 = tpu.matmul %60, %69, %cst_27 {dimension_numbers = #tpu.dot_dimension_numbers<[1], [0], [0], [1], [0, 0, 1, 1], [], []>} : vector<32x64xbf16>, vector<64x64xbf16>, vector<32x64xf32> -> vector<32x64xf32>
    %71 = arith.addf %67, %70 : vector<32x64xf32>
    %c0_28 = arith.constant 0 : index
    %c0_29 = arith.constant 0 : index
    %72 = vector.load %arg4[%c0_28, %c0_29] : memref<1x64xf32, #tpu.memory_space<vmem>>, vector<1x64xf32>
    %73 = vector.broadcast %72 : vector<1x64xf32> to vector<32x64xf32>
    %74 = arith.addf %71, %73 : vector<32x64xf32>
    %cst_30 = arith.constant dense<0.000000e+00> : vector<64xf32>
    %75 = vector.multi_reduction <add>, %74, %cst_30 [0] : vector<32x64xf32> to vector<64xf32>
    %76 = vector.shape_cast %75 : vector<64xf32> to vector<1x64xf32>
    %77 = arith.mulf %74, %74 : vector<32x64xf32>
    %cst_31 = arith.constant dense<0.000000e+00> : vector<64xf32>
    %78 = vector.multi_reduction <add>, %77, %cst_31 [0] : vector<32x64xf32> to vector<64xf32>
    %79 = vector.shape_cast %78 : vector<64xf32> to vector<1x64xf32>
    %80 = tpu.concatenate %76, %79 in 0 : vector<1x64xf32>, vector<1x64xf32> -> vector<2x64xf32>
    %c0_32 = arith.constant 0 : index
    %c0_33 = arith.constant 0 : index
    %c0_34 = arith.constant 0 : index
    %81 = vector.load %arg6[%c0_32, %c0_33, %c0_34] : memref<1x2x64xf32, #tpu.memory_space<vmem>>, vector<1x2x64xf32>
    %82 = vector.shape_cast %81 : vector<1x2x64xf32> to vector<2x64xf32>
    %83 = vector.shape_cast %80 : vector<2x64xf32> to vector<1x2x64xf32>
    tpu.vector_store %arg6[%c0_32, %c0_33, %c0_34], %83 {strides = array<i32>} : memref<1x2x64xf32, #tpu.memory_space<vmem>>, vector<1x2x64xf32>,
    %84 = arith.truncf %74 : vector<32x64xf32> to vector<32x64xbf16>
    %c0_35 = arith.constant 0 : index
    %c0_36 = arith.constant 0 : index
    %85 = vector.load %arg5[%c0_35, %c0_36] : memref<32x64xbf16, #tpu.memory_space<vmem>>, vector<32x64xbf16>
    tpu.vector_store %arg5[%c0_35, %c0_36], %84 {strides = array<i32>} : memref<32x64xbf16, #tpu.memory_space<vmem>>, vector<32x64xbf16>,
    return
  }
  func.func @transform_0(%arg0: i32) -> (i32, i32) {
    %c0_i32 = arith.constant 0 : i32
    %c0_i32_0 = arith.constant 0 : i32
    return %arg0, %c0_i32 : i32, i32
  }
  func.func @transform_1(%arg0: i32) -> (i32, i32) {
    %c0_i32 = arith.constant 0 : i32
    %c0_i32_0 = arith.constant 0 : i32
    %c0_i32_1 = arith.constant 0 : i32
    return %c0_i32, %c0_i32_0 : i32, i32
  }
  func.func @transform_2(%arg0: i32) -> (i32, i32, i32) {
    %c0_i32 = arith.constant 0 : i32
    %c0_i32_0 = arith.constant 0 : i32
    %c0_i32_1 = arith.constant 0 : i32
    %c0_i32_2 = arith.constant 0 : i32
    return %c0_i32, %c0_i32_0, %c0_i32_1 : i32, i32, i32
  }
  func.func @transform_3(%arg0: i32) -> (i32, i32) {
    %c0_i32 = arith.constant 0 : i32
    %c0_i32_0 = arith.constant 0 : i32
    %c0_i32_1 = arith.constant 0 : i32
    return %c0_i32, %c0_i32_0 : i32, i32
  }
  func.func @transform_4(%arg0: i32) -> (i32, i32) {
    %c0_i32 = arith.constant 0 : i32
    %c0_i32_0 = arith.constant 0 : i32
    return %arg0, %c0_i32 : i32, i32
  }
  func.func @transform_5(%arg0: i32) -> (i32, i32, i32) {
    %c0_i32 = arith.constant 0 : i32
    %c0_i32_0 = arith.constant 0 : i32
    %c0_i32_1 = arith.constant 0 : i32
    return %arg0, %c0_i32, %c0_i32_0 : i32, i32, i32
  }
}

module attributes {stable_mosaic.version = 11 : i64} {
  func.func @_k3_bn2_adaption(%arg0: i32, %arg1: memref<16x128xbf16, #tpu.memory_space<vmem>>, %arg2: memref<15x128xf32, #tpu.memory_space<vmem>>, %arg3: memref<16x128xf32, #tpu.memory_space<vmem>>) attributes {dimension_semantics = [#tpu.dimension_semantics<parallel>], iteration_bounds = array<i64: 1>, scalar_prefetch = 0 : i64, scratch_operands = 0 : i64, tpu.core_type = #tpu.core_type<tc>, window_params = [{transform_indices = @transform_0, window_bounds = array<i64: 16, 128>}, {pipeline_mode = #tpu.pipeline_mode<synchronous>, transform_indices = @transform_1, window_bounds = array<i64: 15, 128>}, {transform_indices = @transform_2, window_bounds = array<i64: 16, 128>}]} {
    %c0 = arith.constant 0 : index
    %c0_0 = arith.constant 0 : index
    %0 = vector.load %arg1[%c0, %c0_0] : memref<16x128xbf16, #tpu.memory_space<vmem>>, vector<16x128xbf16>
    %1 = arith.extf %0 : vector<16x128xbf16> to vector<16x128xf32>
    %c0_1 = arith.constant 0 : index
    %c0_2 = arith.constant 0 : index
    %2 = vector.load %arg2[%c0_1, %c0_2] : memref<15x128xf32, #tpu.memory_space<vmem>>, vector<1x128xf32>
    %3 = vector.broadcast %2 : vector<1x128xf32> to vector<16x128xf32>
    %4 = arith.mulf %1, %3 : vector<16x128xf32>
    %c1 = arith.constant 1 : index
    %c0_3 = arith.constant 0 : index
    %5 = vector.load %arg2[%c1, %c0_3] : memref<15x128xf32, #tpu.memory_space<vmem>>, vector<1x128xf32>
    %6 = vector.broadcast %5 : vector<1x128xf32> to vector<16x128xf32>
    %7 = arith.addf %4, %6 : vector<16x128xf32>
    %cst = arith.constant 0.000000e+00 : f32
    %8 = vector.broadcast %cst : f32 to vector<16x128xf32>
    %9 = arith.maximumf %7, %8 : vector<16x128xf32>
    %c14 = arith.constant 14 : index
    %c0_4 = arith.constant 0 : index
    %10 = vector.load %arg2[%c14, %c0_4] : memref<15x128xf32, #tpu.memory_space<vmem>>, vector<1x128xf32>
    %11 = vector.broadcast %10 : vector<1x128xf32> to vector<16x128xf32>
    %12 = arith.addf %9, %11 : vector<16x128xf32>
    %c2 = arith.constant 2 : index
    %c0_5 = arith.constant 0 : index
    %13 = vector.load %arg2[%c2, %c0_5] : memref<15x128xf32, #tpu.memory_space<vmem>>, vector<1x128xf32>
    %14 = vector.broadcast %13 : vector<1x128xf32> to vector<16x128xf32>
    %15 = arith.mulf %9, %14 : vector<16x128xf32>
    %c6 = arith.constant 6 : index
    %c0_6 = arith.constant 0 : index
    %16 = vector.load %arg2[%c6, %c0_6] : memref<15x128xf32, #tpu.memory_space<vmem>>, vector<1x128xf32>
    %17 = vector.broadcast %16 : vector<1x128xf32> to vector<16x128xf32>
    %18 = arith.addf %15, %17 : vector<16x128xf32>
    %cst_7 = arith.constant 0.000000e+00 : f32
    %19 = vector.broadcast %cst_7 : f32 to vector<16x128xf32>
    %20 = arith.maximumf %18, %19 : vector<16x128xf32>
    %c10 = arith.constant 10 : index
    %c0_8 = arith.constant 0 : index
    %21 = vector.load %arg2[%c10, %c0_8] : memref<15x128xf32, #tpu.memory_space<vmem>>, vector<1x128xf32>
    %22 = vector.broadcast %21 : vector<1x128xf32> to vector<16x128xf32>
    %23 = arith.mulf %20, %22 : vector<16x128xf32>
    %24 = arith.addf %12, %23 : vector<16x128xf32>
    %c3 = arith.constant 3 : index
    %c0_9 = arith.constant 0 : index
    %25 = vector.load %arg2[%c3, %c0_9] : memref<15x128xf32, #tpu.memory_space<vmem>>, vector<1x128xf32>
    %26 = vector.broadcast %25 : vector<1x128xf32> to vector<16x128xf32>
    %27 = arith.mulf %9, %26 : vector<16x128xf32>
    %c7 = arith.constant 7 : index
    %c0_10 = arith.constant 0 : index
    %28 = vector.load %arg2[%c7, %c0_10] : memref<15x128xf32, #tpu.memory_space<vmem>>, vector<1x128xf32>
    %29 = vector.broadcast %28 : vector<1x128xf32> to vector<16x128xf32>
    %30 = arith.addf %27, %29 : vector<16x128xf32>
    %cst_11 = arith.constant 0.000000e+00 : f32
    %31 = vector.broadcast %cst_11 : f32 to vector<16x128xf32>
    %32 = arith.maximumf %30, %31 : vector<16x128xf32>
    %c11 = arith.constant 11 : index
    %c0_12 = arith.constant 0 : index
    %33 = vector.load %arg2[%c11, %c0_12] : memref<15x128xf32, #tpu.memory_space<vmem>>, vector<1x128xf32>
    %34 = vector.broadcast %33 : vector<1x128xf32> to vector<16x128xf32>
    %35 = arith.mulf %32, %34 : vector<16x128xf32>
    %36 = arith.addf %24, %35 : vector<16x128xf32>
    %c4 = arith.constant 4 : index
    %c0_13 = arith.constant 0 : index
    %37 = vector.load %arg2[%c4, %c0_13] : memref<15x128xf32, #tpu.memory_space<vmem>>, vector<1x128xf32>
    %38 = vector.broadcast %37 : vector<1x128xf32> to vector<16x128xf32>
    %39 = arith.mulf %9, %38 : vector<16x128xf32>
    %c8 = arith.constant 8 : index
    %c0_14 = arith.constant 0 : index
    %40 = vector.load %arg2[%c8, %c0_14] : memref<15x128xf32, #tpu.memory_space<vmem>>, vector<1x128xf32>
    %41 = vector.broadcast %40 : vector<1x128xf32> to vector<16x128xf32>
    %42 = arith.addf %39, %41 : vector<16x128xf32>
    %cst_15 = arith.constant 0.000000e+00 : f32
    %43 = vector.broadcast %cst_15 : f32 to vector<16x128xf32>
    %44 = arith.maximumf %42, %43 : vector<16x128xf32>
    %c12 = arith.constant 12 : index
    %c0_16 = arith.constant 0 : index
    %45 = vector.load %arg2[%c12, %c0_16] : memref<15x128xf32, #tpu.memory_space<vmem>>, vector<1x128xf32>
    %46 = vector.broadcast %45 : vector<1x128xf32> to vector<16x128xf32>
    %47 = arith.mulf %44, %46 : vector<16x128xf32>
    %48 = arith.addf %36, %47 : vector<16x128xf32>
    %c5 = arith.constant 5 : index
    %c0_17 = arith.constant 0 : index
    %49 = vector.load %arg2[%c5, %c0_17] : memref<15x128xf32, #tpu.memory_space<vmem>>, vector<1x128xf32>
    %50 = vector.broadcast %49 : vector<1x128xf32> to vector<16x128xf32>
    %51 = arith.mulf %9, %50 : vector<16x128xf32>
    %c9 = arith.constant 9 : index
    %c0_18 = arith.constant 0 : index
    %52 = vector.load %arg2[%c9, %c0_18] : memref<15x128xf32, #tpu.memory_space<vmem>>, vector<1x128xf32>
    %53 = vector.broadcast %52 : vector<1x128xf32> to vector<16x128xf32>
    %54 = arith.addf %51, %53 : vector<16x128xf32>
    %cst_19 = arith.constant 0.000000e+00 : f32
    %55 = vector.broadcast %cst_19 : f32 to vector<16x128xf32>
    %56 = arith.maximumf %54, %55 : vector<16x128xf32>
    %c13 = arith.constant 13 : index
    %c0_20 = arith.constant 0 : index
    %57 = vector.load %arg2[%c13, %c0_20] : memref<15x128xf32, #tpu.memory_space<vmem>>, vector<1x128xf32>
    %58 = vector.broadcast %57 : vector<1x128xf32> to vector<16x128xf32>
    %59 = arith.mulf %56, %58 : vector<16x128xf32>
    %60 = arith.addf %48, %59 : vector<16x128xf32>
    %c0_21 = arith.constant 0 : index
    %c0_22 = arith.constant 0 : index
    %61 = vector.load %arg3[%c0_21, %c0_22] : memref<16x128xf32, #tpu.memory_space<vmem>>, vector<16x128xf32>
    tpu.vector_store %arg3[%c0_21, %c0_22], %60 {strides = array<i32>} : memref<16x128xf32, #tpu.memory_space<vmem>>, vector<16x128xf32>,
    return
  }
  func.func @transform_0(%arg0: i32) -> (i32, i32) {
    %c0_i32 = arith.constant 0 : i32
    %c0_i32_0 = arith.constant 0 : i32
    return %arg0, %c0_i32 : i32, i32
  }
  func.func @transform_1(%arg0: i32) -> (i32, i32) {
    %c0_i32 = arith.constant 0 : i32
    %c0_i32_0 = arith.constant 0 : i32
    %c0_i32_1 = arith.constant 0 : i32
    return %c0_i32, %c0_i32_0 : i32, i32
  }
  func.func @transform_2(%arg0: i32) -> (i32, i32) {
    %c0_i32 = arith.constant 0 : i32
    %c0_i32_0 = arith.constant 0 : i32
    return %arg0, %c0_i32 : i32, i32
  }
}

</mosaic_0001>

<bundles_post_ra>
// kernel: up_forward.3
= control target key start
LH: loop header
LB: loop body
LE: loop exit
PB: predicated region body
PF: predicated region fallthrough
CT: control target
= control target key end

     0   :  { %v996_v0 = vmov 0.0   ;;  %vm997_vm0 = vmmov 0   ;;  %vm55_vm1 = vcmask 261120   ;;  %vm115_vm2 = vcmask 130048   ;;  %s1198_s3 = inlined_call_operand.vmem [shape: bf16[32,64], index: 3, kind: input, shape index: {}]   ;;  %s1199_s1 = inlined_call_operand.vmem [shape: bf16[16,32], index: 1, kind: input, shape index: {}]   ;;  %s1200_s2 = inlined_call_operand.vmem [shape: bf16[32,16], index: 2, kind: input, shape index: {}]   ;;  %s1201_s4 = inlined_call_operand.vmem [shape: bf16[3,128,64], index: 4, kind: input, shape index: {}]   ;;  %s1202_s0 = inlined_call_operand.vmem [shape: bf16[32,64], index: 0, kind: input, shape index: {}]   ;;  %s1203_s5 = inlined_call_operand.vmem [shape: f32[1,64], index: 5, kind: input, shape index: {}]   ;;  %s1204_s6 = inlined_call_operand.vmem [shape: bf16[32,64], index: 6, kind: output, shape index: {0}]   ;;  %s1205_s7 = inlined_call_operand.vmem [shape: f32[1,2,64], index: 7, kind: output, shape index: {1}]  }
   0x1   :  { %887 = vmatprep.subr.bf16.mxu0 %v996_v0  ;;  %v965_v1 = vld [vmem:[%s1198_s3 + $0x8] sm:$0xff]   ;;  %891 = vmatprep.mubr.msk.bf16.mxu0 %vm997_vm0, %v996_v0  ;;  %v966_v2 = vld [vmem:[%s1198_s3] sm:$0xff]   ;;  %v970_v11 = vld [vmem:[%s1201_s4 + $0x78] sm:$0xff]   ;;  %v198_v34 = vlaneseq  ;;  %v999_v43 = vmov 0   ;;  %vm189_vm9 = vcmask 523264   ;;  %vm271_vm12 = vcmask 1040384  }
   0x2   :  { %888 = vmatpush3.bf16.msra.mxu0 %v965_v1  ;;  %v967_v3 = vld [vmem:[%s1199_s1] sm:$0xff]   ;;  %v969_v10 = vld [vmem:[%s1200_s2 + $0x8] sm:$0xff]   ;;  %v971_v12 = vld [vmem:[%s1201_s4 + $0x70] sm:$0xff]   ;;  %901 = vmatprep.subr.bf16.mxu1 %v970_v11  ;;  %vm255_vm11 = vsmask.f32 256 }
   0x3   :  { %889 = vmatprep.subr.bf16.mxu0 %v996_v0  ;;  %v968_v4 = vld [vmem:[%s1200_s2] sm:$0xff]   ;;  %902 = vmatpush3.bf16.msra.mxu1 %v970_v11  ;;  %v973_v13 = vld [vmem:[%s1201_s4 + $0x38] sm:$0xff]   ;;  %v972_v14 = vld [vmem:[%s1201_s4 + $0x68] sm:$0xff]   ;;  %s998_s2 = smov 64   ;;  %v199_v35 = vshrl.u32 %v198_v34, 7 }
   0x4   :  { %903 = vmatprep.subr.bf16.mxu1 %v971_v12  ;;  %v975_v15 = vld [vmem:[%s1201_s4 + $0x30] sm:$0xff]   ;;  %v977_v16 = vld [vmem:[%s1201_s4 + $0x28] sm:$0xff]   ;;  %v974_v17 = vld [vmem:[%s1201_s4 + $0x60] sm:$0xff]   ;;  %vm304_vm15 = vsmask.f32 7424 }
   0x5   :  { %v976_v18 = vld [vmem:[%s1201_s4 + $0x58] sm:$0xff]   ;;  %v979_v19 = vld [vmem:[%s1201_s4 + $0x20] sm:$0xff]   ;;  %v978_v21 = vld [vmem:[%s1201_s4 + $0x50] sm:$0xff]   ;;  %v200_v36 = vadd.s32 8, %v199_v35  ;;  %v207_v37 = vand.u32 15, %v199_v35  ;;  %v201_v38 = vadd.s32 16, %v199_v35 }
   0x6   :  { %890 = vmatpush3.bf16.msra.mxu0 %v966_v2  ;;  %v981_v20 = vld [vmem:[%s1201_s4 + $0x18] sm:$0xff]   ;;  %v980_v22 = vld [vmem:[%s1201_s4 + $0x48] sm:$0xff]   ;;  %v982_v23 = vld [vmem:[%s1201_s4 + $0x40] sm:$0xff]  }
   0x7   :  { %904 = vmatpush3.bf16.msra.mxu1 %v971_v12  ;;  %v983_v24 = vld [vmem:[%s1201_s4 + $0x10] sm:$0xff]   ;;  %v985_v25 = vld [vmem:[%s1201_s4 + $0x8] sm:$0xff]   ;;  %v986_v26 = vld [vmem:[%s1201_s4 + $0xb8] sm:$0xff]   ;;  %v214_v39 = vand.u32 15, %v200_v36  ;;  %vm251_vm3 = vcmp.eq.s32.totalorder %v207_v37, 0  ;;  %v221_v40 = vand.u32 15, %v201_v38 }
   0x8   :  { %905 = vmatprep.subr.bf16.mxu1 %v972_v14  ;;  %v988_v29 = vld [vmem:[%s1201_s4] sm:$0xff]   ;;  %vm283_vm4 = vmpackc.low %vm997_vm0, %vm997_vm0  ;;  %v987_v49 = vld [vmem:[%s1202_s0 + $0x8] sm:$0xff]  }
   0x9   :  { %892 = vmatmul.mubr.msk.bf16.vlgmr.msra.gmra.mxu0 %vm55_vm1, %v967_v3  ;;  %vm301_vm5 = vcmp.eq.s32.totalorder %v214_v39, 15  ;;  %vm282_vm6 = vmpackc.low %vm251_vm3, %vm251_vm3  ;;  %v984_v41 = vld [vmem:[%s1202_s0] sm:$0xff]   ;;  %vm1112_vm8 = vcmp.eq.s32.totalorder %v221_v40, 0  ;;  %v1117_v44 = vsel %vm283_vm4, 65537, %v999_v43  ;;  %v989_v58 = vld [vmem:[%s1201_s4 + $0xb0] sm:$0xff]   ;;  %vm312_vm4 = vcmask 1047552  }
   0xa   :  { %897 = vmatprep.mubr.msk.bf16.mxu0 %vm115_vm2, %v968_v4  ;;  %vm324_vm7 = vmpackc.low %vm301_vm5, %vm301_vm5  ;;  %v286_v45 = vsel %vm282_vm6, 65537, %v999_v43  ;;  %v992_v11 = vld [vmem:[%s1201_s4 + $0x98] sm:$0xff]  }
   0xb   :  { %906 = vmatpush3.bf16.msra.mxu1 %v972_v14  ;;  %v328_v47 = vsel %vm324_vm7, 65537, %v999_v43  ;;  %vm284_vm10 = vmpackc.low %vm1112_vm8, %vm1112_vm8  ;;  %v770_v50 = vcombine.low %v286_v45, %v1117_v44  ;;  %v994_v14 = vld [vmem:[%s1201_s4 + $0x88] sm:$0xff]   ;;  %vm747_vm7 = vcmask 519168   ;;  %vm729_vm8 = vcmask 517120  }
   0xc   :  { %907 = vmatprep.subr.bf16.mxu1 %v974_v17  ;;  %v772_v53 = vcombine.low %v1117_v44, %v328_v47  ;;  %v288_v54 = vsel %vm284_vm10, 65537, %v999_v43  ;;  %vm1137_vm13 = vmand %vm271_vm12, %vm255_vm11 }
   0xd   :  { %vm847_vm14 = vcmp.eq.s16.totalorder %v770_v50, 0  ;;  %v771_v0 = vcombine.low %v288_v54, %v1117_v44  ;;  %vm313_vm5 = vmand %vm312_vm4, %vm304_vm15 }
   0xe   :  { %vm849_vm0 = vcmp.eq.s16.totalorder %v772_v53, 0 }
   0xf   :  { %908 = vmatpush3.bf16.msra.mxu1 %v974_v17  ;;  %vm848_vm1 = vcmp.eq.s16.totalorder %v771_v0, 0 }
  0x10   :  { %909 = vmatprep.subr.bf16.mxu1 %v976_v18 }
  0x13   :  { %910 = vmatpush3.bf16.msra.mxu1 %v976_v18 }
  0x14   :  { %911 = vmatprep.subr.bf16.mxu1 %v978_v21 }
  0x17   :  { %912 = vmatpush3.bf16.msra.mxu1 %v978_v21 }
  0x18   :  { %913 = vmatprep.subr.bf16.mxu1 %v980_v22 }
  0x1b   :  { %914 = vmatpush3.bf16.msra.mxu1 %v980_v22 }
  0x1c   :  { %915 = vmatprep.subr.bf16.mxu1 %v982_v23 }
  0x1f   :  { %916 = vmatpush3.bf16.msra.mxu1 %v982_v23 }
  0x20   :  { %941 = vmatprep.subr.bf16.mxu1 %v986_v26 }
  0xc9   :  { %v93_v5 = vpop.f32.mrf.mxu0 }
  0xcb   :  { %v893_v6 = vpop.f32.mrf.mxu0 }
  0xcd   :  { %v96_v7 = vpop.f32.mrf.mxu0 }
  0xce   :  { %v104_v8 = vpack.c.bf16 %v96_v7, %v93_v5  ;;  %v990_v5 = vld [vmem:[%s1201_s4 + $0xa8] sm:$0xff]  }
  0xcf   :  { %v894_v9 = vpop.f32.mrf.mxu0 }
  0xd0   :  { %895 = vmatprep.subr.bf16.mxu0 %v104_v8  ;;  %v991_v9 = vld [vmem:[%s1201_s4 + $0xa0] sm:$0xff]  }
  0xd1   :  { %896 = vmatpush3.bf16.msra.mxu0 %v104_v8 }
  0xd2   :  { %921 = vmatprep.subr.bf16.mxu0 %v973_v13 }
  0xd4   :  { %898 = vmatmul.mubr.msk.bf16.vlgmr.msra.gmra.mxu0 %vm115_vm2, %v969_v10  ;;  %v202_v10 = vadd.s32 24, %v199_v35 }
  0xd5   :  { %922 = vmatpush3.bf16.msra.mxu0 %v973_v13  ;;  %v993_v13 = vld [vmem:[%s1201_s4 + $0x90] sm:$0xff]  }
  0xd6   :  { %923 = vmatprep.subr.bf16.mxu0 %v975_v15  ;;  %v228_v12 = vand.u32 15, %v202_v10 }
  0xd8   :  { %vm303_vm2 = vcmp.eq.s32.totalorder %v228_v12, 15 }
  0xd9   :  { %924 = vmatpush3.bf16.msra.mxu0 %v975_v15  ;;  %vm326_vm3 = vmpackc.low %vm303_vm2, %vm303_vm2  ;;  %v995_v15 = vld [vmem:[%s1201_s4 + $0x80] sm:$0xff]  }
  0xda   :  { %925 = vmatprep.subr.bf16.mxu0 %v977_v16 }
  0xdd   :  { %926 = vmatpush3.bf16.msra.mxu0 %v977_v16  ;;  %v330_v16 = vsel %vm326_vm3, 65537, %v999_v43 }
  0xde   :  { %927 = vmatprep.subr.bf16.mxu0 %v979_v19  ;;  %v773_v17 = vcombine.low %v1117_v44, %v330_v16 }
  0xe0   :  { %vm850_vm6 = vcmp.eq.s16.totalorder %v773_v17, 0 }
  0xe1   :  { %928 = vmatpush3.bf16.msra.mxu0 %v979_v19 }
  0xe2   :  { %929 = vmatprep.subr.bf16.mxu0 %v981_v20 }
  0xe5   :  { %930 = vmatpush3.bf16.msra.mxu0 %v981_v20 }
  0xe6   :  { %931 = vmatprep.subr.bf16.mxu0 %v983_v24 }
  0xe9   :  { %932 = vmatpush3.bf16.msra.mxu0 %v983_v24 }
  0xea   :  { %933 = vmatprep.subr.bf16.mxu0 %v985_v25 }
  0xed   :  { %934 = vmatpush3.bf16.msra.mxu0 %v985_v25 }
  0xee   :  { %935 = vmatprep.subr.bf16.mxu0 %v988_v29 }
  0xf1   :  { %936 = vmatpush3.bf16.msra.mxu0 %v988_v29  ;;  %v838_v29 = vld [vmem:[%s1203_s5] ss:$0 sm:$0xff] }
 0x194   :  { %v899_v27 = vpop.f32.mrf.mxu0 }
 0x196   :  { %v156_v28 = vpop.f32.mrf.mxu0 }
 0x198   :  { %v900_v30 = vpop.f32.mrf.mxu0 }
 0x199   :  { %v172_v33 = vpack.c.bf16 %v900_v30, %v899_v27 }
 0x19a   :  { %v159_v31 = vpop.f32.mrf.mxu0 }
 0x19b   :  { %v171_v32 = vpack.c.bf16 %v159_v31, %v156_v28 }
 0x19d   :  { %185 = vrot.lane.b32.xlu0 %v171_v32, %s998_s2 }
 0x1a1   :  { %187 = vrot.lane.b32.xlu0 %v172_v33, %s998_s2 }
 0x20f   :  { %v186_v46 = vpop.permute.xlu0 %185 }
 0x210   :  { %v192_v48 = vsel %vm189_vm9, %v984_v41, %v186_v46 }
 0x211   :  { %v256_v51 = vshrl.u32 %v192_v48, 16  ;;  %v259_v52 = vshll.u32 %v192_v48, 16  ;;  %917 = vmatprep.mubr.bf16.mxu1 %v192_v48 }
 0x213   :  { %v258_v55 = vrot.slane %v256_v51, 7  ;;  %v305_v56 = vrot.slane %v259_v52, 1  ;;  %v188_v57 = vpop.permute.xlu0 %187 }
 0x214   :  { %v196_v59 = vsel %vm189_vm9, %v987_v49, %v188_v57 }
 0x215   :  { %v262_v61 = vshrl.u32 %v196_v59, 16  ;;  %v265_v62 = vshll.u32 %v196_v59, 16  ;;  %918 = vmatmul.mubr.bf16.vlgmr.msra.gmra.mxu1 %v196_v59  ;;  %v261_v63 = vor.u32 %v259_v52, %v258_v55  ;;  %v306_v1 = vor.u32 %v305_v56, %v256_v51 }
 0x216   :  { %942 = vmatpush3.bf16.msra.mxu1 %v986_v26 }
 0x217   :  { %v264_v2 = vrot.slane %v262_v61, 7  ;;  %v307_v3 = vrot.slane %v265_v62, 1  ;;  %v273_v4 = vsel %vm1137_vm13, 0, %v261_v63  ;;  %943 = vmatprep.subr.bf16.mxu1 %v989_v58 }
 0x218   :  { %937 = vmatprep.mubr.msk.bf16.mxu0 %vm847_vm14, %v273_v4 }
 0x219   :  { %v267_v6 = vor.u32 %v265_v62, %v264_v2  ;;  %v308_v7 = vsel %vm304_vm15, %v306_v1, %v307_v3  ;;  %v309_v18 = vor.u32 %v307_v3, %v262_v61 }
 0x21a   :  { %944 = vmatpush3.bf16.msra.mxu1 %v989_v58  ;;  %957 = vmatprep.mubr.msk.bf16.mxu1 %vm849_vm0, %v308_v7 }
 0x21b   :  { %v268_v8 = vsel %vm255_vm11, %v258_v55, %v267_v6  ;;  %945 = vmatprep.subr.bf16.mxu1 %v990_v5  ;;  %v314_v19 = vsel %vm313_vm5, %v309_v18, 0 }
 0x21c   :  { %938 = vmatmul.mubr.msk.bf16.vlgmr.msra.gmra.mxu0 %vm848_vm1, %v268_v8 }
 0x21e   :  { %946 = vmatpush3.bf16.msra.mxu1 %v990_v5 }
 0x21f   :  { %947 = vmatprep.subr.bf16.mxu1 %v991_v9 }
 0x222   :  { %948 = vmatpush3.bf16.msra.mxu1 %v991_v9 }
 0x223   :  { %949 = vmatprep.subr.bf16.mxu1 %v992_v11 }
 0x226   :  { %950 = vmatpush3.bf16.msra.mxu1 %v992_v11 }
 0x227   :  { %951 = vmatprep.subr.bf16.mxu1 %v993_v13 }
 0x22a   :  { %952 = vmatpush3.bf16.msra.mxu1 %v993_v13 }
 0x22b   :  { %953 = vmatprep.subr.bf16.mxu1 %v994_v14 }
 0x22e   :  { %954 = vmatpush3.bf16.msra.mxu1 %v994_v14 }
 0x22f   :  { %955 = vmatprep.subr.bf16.mxu1 %v995_v15 }
 0x232   :  { %956 = vmatpush3.bf16.msra.mxu1 %v995_v15 }
 0x235   :  { %958 = vmatmul.mubr.msk.bf16.vlgmr.msra.gmra.mxu1 %vm850_vm6, %v314_v19 }
 0x2d5   :  { %v919_v20 = vpop.f32.mrf.mxu1 }
 0x2d7   :  { %v456_v21 = vpop.f32.mrf.mxu1 }
 0x2d9   :  { %v920_v23 = vpop.f32.mrf.mxu1 }
 0x2db   :  { %v459_v25 = vpop.f32.mrf.mxu1 }
 0x2dc   :  { %v939_v22 = vpop.f32.mrf.mxu0 }
 0x2dd   :  { %v562_v26 = vadd.f32 %v939_v22, %v919_v20 }
 0x2de   :  { %v553_v24 = vpop.f32.mrf.mxu0 }
 0x2df   :  { %v554_v30 = vadd.f32 %v553_v24, %v456_v21 }
 0x2e0   :  { %v940_v27 = vpop.f32.mrf.mxu0 }
 0x2e1   :  { %v565_v36 = vadd.f32 %v940_v27, %v920_v23 }
 0x2e2   :  { %v556_v33 = vpop.f32.mrf.mxu0 }
 0x2e3   :  { %v557_v40 = vadd.f32 %v556_v33, %v459_v25 }
 0x2f5   :  { %v959_v28 = vpop.f32.mrf.mxu1 }
 0x2f6   :  { %v684_v31 = vadd.f32 %v959_v28, %v562_v26 }
 0x2f7   :  { %v667_v32 = vpop.f32.mrf.mxu1 }
 0x2f8   :  { %v695_v34 = vadd.f32 %v838_v29, %v684_v31  ;;  %v682_v35 = vadd.f32 %v667_v32, %v554_v30 }
 0x2f9   :  { %v960_v37 = vpop.f32.mrf.mxu1 }
 0x2fa   :  { %v845_v38 = vpack.c.bf16 %v695_v34, %v695_v34  ;;  %v693_v39 = vadd.f32 %v838_v29, %v682_v35  ;;  %v685_v41 = vadd.f32 %v960_v37, %v565_v36  ;;  %v712_v49 = vmul.f32 %v695_v34, %v695_v34 }
 0x2fb   :  { %v670_v42 = vpop.f32.mrf.mxu1  ;;  %v700_v55 = vsel %vm189_vm9, %v695_v34, 0.0 }
 0x2fc   :  { %750 = vst.msk [vmem:[%s1204_s6 + $0x8] sm:$0xf] %vm747_vm7, %v845_v38  ;;  %v843_v43 = vpack.c.bf16 %v693_v39, %v693_v39  ;;  %v696_v44 = vadd.f32 %v838_v29, %v685_v41  ;;  %v683_v45 = vadd.f32 %v670_v42, %v557_v40  ;;  %v710_v46 = vmul.f32 %v693_v39, %v693_v39 }
 0x2fd   :  { %v697_v50 = vsel %vm189_vm9, %v693_v39, 0.0  ;;  %v717_v61 = vsel %vm189_vm9, %v712_v49, 0.0 }
 0x2fe   :  { %748 = vst.msk [vmem:[%s1204_s6] sm:$0xf] %vm747_vm7, %v843_v43  ;;  %v846_v47 = vpack.c.bf16 %v696_v44, %v696_v44  ;;  %v694_v48 = vadd.f32 %v838_v29, %v683_v45  ;;  %v714_v56 = vsel %vm189_vm9, %v710_v46, 0.0  ;;  %v713_v57 = vmul.f32 %v696_v44, %v696_v44 }
 0x2ff   :  { %v702_v62 = vsel %vm189_vm9, %v696_v44, 0.0 }
 0x300   :  { %751 = vst.msk [vmem:[%s1204_s6 + $0xc] sm:$0xf] %vm747_vm7, %v846_v47  ;;  %v698_v51 = vsel %vm189_vm9, %v694_v48, 0.0  ;;  %v711_v52 = vmul.f32 %v694_v48, %v694_v48  ;;  %v844_v53 = vpack.c.bf16 %v694_v48, %v694_v48  ;;  %v719_v1 = vsel %vm189_vm9, %v713_v57, 0.0 }
 0x301   :  { %v699_v54 = vadd.f32 %v698_v51, %v697_v50 }
 0x302   :  { %v715_v58 = vsel %vm189_vm9, %v711_v52, 0.0  ;;  %749 = vst.msk [vmem:[%s1204_s6 + $0x4] sm:$0xf] %vm747_vm7, %v844_v53 }
 0x303   :  { %v701_v59 = vadd.f32 %v700_v55, %v699_v54  ;;  %v716_v60 = vadd.f32 %v715_v58, %v714_v56 }
 0x305   :  { %v703_v63 = vadd.f32 %v702_v62, %v701_v59  ;;  %v718_v0 = vadd.f32 %v717_v61, %v716_v60 }
 0x307   :  { %v704_v2 = vrot.slane %v703_v63, 4  ;;  %v720_v3 = vadd.f32 %v719_v1, %v718_v0 }
 0x309   :  { %v705_v4 = vadd.f32 %v704_v2, %v703_v63  ;;  %v721_v5 = vrot.slane %v720_v3, 4 }
 0x30b   :  { %v706_v6 = vrot.slane %v705_v4, 2  ;;  %v722_v7 = vadd.f32 %v721_v5, %v720_v3 }
 0x30d   :  { %v707_v8 = vadd.f32 %v706_v6, %v705_v4  ;;  %v723_v9 = vrot.slane %v722_v7, 2 }
 0x30f   :  { %v708_v10 = vrot.slane %v707_v8, 1  ;;  %v724_v11 = vadd.f32 %v723_v9, %v722_v7 }
 0x311   :  { %v725_v12 = vrot.slane %v724_v11, 1  ;;  %v709_v13 = vadd.f32 %v708_v10, %v707_v8 }
 0x313   :  { %v726_v14 = vadd.f32 %v725_v12, %v724_v11 }
 0x315   :  { %v728_v15 = vsel %vm271_vm12, %v709_v13, %v726_v14 }
 0x316   :  { %730 = vst.msk [vmem:[%s1205_s7] sm:$0x3] %vm729_vm8, %v728_v15 }

// kernel: tile.9
= control target key start
LH: loop header
LB: loop body
LE: loop exit
PB: predicated region body
PF: predicated region fallthrough
CT: control target
= control target key end

     0   :  { %vm78_vm0 = vcmask 1047556   ;;  %vm86_vm1 = vcmask 1046532   ;;  %vm80_vm2 = vcmask 523264   ;;  %vm99_vm3 = vcmask 1048064   ;;  %s214_s0 = inlined_call_operand.vmem [shape: f32[15,2,64], index: 0, kind: input, shape index: {}]   ;;  %s215_s1 = inlined_call_operand.vmem [shape: f32[15,128], index: 1, kind: output, shape index: {}]  }
   0x1   :  { %v132_v0 = vld [vmem:[%s214_s0 + $0xe] sm:$0x3]  ;;  %v133_v1 = vld [vmem:[%s214_s0 + $0xc] sm:$0x3]  ;;  %v134_v2 = vld [vmem:[%s214_s0 + $0xa] sm:$0x3] }
   0x2   :  { %44 = vst [vmem:[#allocation0 + $0x38] sm:$0x3] %v132_v0  ;;  %49 = vst [vmem:[#allocation0 + $0x30] sm:$0x3] %v133_v1  ;;  %v135_v3 = vld [vmem:[%s214_s0 + $0x8] sm:$0x3] }
   0x3   :  { %54 = vst [vmem:[#allocation0 + $0x28] sm:$0x3] %v134_v2  ;;  %v136_v4 = vld [vmem:[%s214_s0 + $0x6] sm:$0x3]  ;;  %v137_v5 = vld [vmem:[%s214_s0 + $0x4] sm:$0x3] }
   0x4   :  { %59 = vst [vmem:[#allocation0 + $0x20] sm:$0x3] %v135_v3  ;;  %64 = vst [vmem:[#allocation0 + $0x18] sm:$0x3] %v136_v4  ;;  %v138_v6 = vld [vmem:[%s214_s0 + $0x2] sm:$0x3] }
   0x5   :  { %69 = vst [vmem:[#allocation0 + $0x10] sm:$0x3] %v137_v5  ;;  %v74_v7 = vld [vmem:[%s214_s0] sm:$0x3]  ;;  %73 = vst [vmem:[#allocation0 + $0x8] sm:$0x3] %v138_v6 }
   0x6   :  { %75 = vst [vmem:[#allocation0] sm:$0x3] %v74_v7  ;;  %v125_v8 = vld [vmem:[%s214_s0 + $0x1c] sm:$0x3]  ;;  %v126_v9 = vld [vmem:[%s214_s0 + $0x1a] sm:$0x3] }
   0x7   :  { %v127_v10 = vld [vmem:[%s214_s0 + $0x18] sm:$0x3]  ;;  %9 = vst [vmem:[#allocation0 + $0x70] sm:$0x3] %v125_v8  ;;  %14 = vst [vmem:[#allocation0 + $0x68] sm:$0x3] %v126_v9 }
   0x8   :  { %19 = vst [vmem:[#allocation0 + $0x60] sm:$0x3] %v127_v10  ;;  %v128_v11 = vld [vmem:[%s214_s0 + $0x16] sm:$0x3]  ;;  %v129_v12 = vld [vmem:[%s214_s0 + $0x14] sm:$0x3] }
   0x9   :  { %v130_v13 = vld [vmem:[%s214_s0 + $0x12] sm:$0x3]  ;;  %24 = vst [vmem:[#allocation0 + $0x58] sm:$0x3] %v128_v11  ;;  %29 = vst [vmem:[#allocation0 + $0x50] sm:$0x3] %v129_v12 }
   0xa   :  { %34 = vst [vmem:[#allocation0 + $0x48] sm:$0x3] %v130_v13  ;;  %v131_v14 = vld [vmem:[%s214_s0 + $0x10] sm:$0x3]  ;;  %s142_s0 = smov 64  }
   0xb   :  { %39 = vst [vmem:[#allocation0 + $0x40] sm:$0x3] %v131_v14  ;;  %v94_v15 = vld [vmem:[#allocation0 + $0x1] ss:$8 sm:$0xf0]  }
   0xc   :  { %v77_v16 = vld [vmem:[#allocation0] ss:$8 sm:$0xf0]  }
   0xd   :  { %v76_v17 = vld [vmem:[#allocation0] ss:$8 sm:$0xf]   ;;  %v92_v18 = vld [vmem:[#allocation0 + $0x1] ss:$8 sm:$0xf]  }
   0xe   :  { %v96_v19 = vsel %vm78_vm0, %v94_v15, %v92_v18  ;;  %v79_v20 = vsel %vm78_vm0, %v77_v16, %v76_v17 }
   0xf   :  { %v104_v21 = vld [vmem:[#allocation0 + $0x41] ss:$8 sm:$0x70]   ;;  %v85_v22 = vld [vmem:[#allocation0 + $0x40] ss:$8 sm:$0x70]   ;;  %97 = vrot.lane.b32.xlu0 %v96_v19, %s142_s0 }
  0x10   :  { %81 = vst.msk [vmem:[%s215_s1] sm:$0xff] %vm80_vm2, %v79_v20  }
  0x12   :  { %v102_v23 = vld [vmem:[#allocation0 + $0x41] ss:$8 sm:$0xf]   ;;  %v83_v24 = vld [vmem:[#allocation0 + $0x40] ss:$8 sm:$0xf]  }
  0x13   :  { %v106_v25 = vsel %vm86_vm1, %v104_v21, %v102_v23  ;;  %v87_v26 = vsel %vm86_vm1, %v85_v22, %v83_v24 }
  0x14   :  { %139 = vst.msk [vmem:[%s215_s1 + $0x8] sm:$0x7f] %vm80_vm2, %v87_v26   ;;  %107 = vrot.lane.b32.xlu0 %v106_v25, %s142_s0 }
  0x81   :  { %v98_v27 = vpop.permute.xlu0 %97  }
  0x82   :  { %100 = vst.msk [vmem:[%s215_s1] sm:$0xff] %vm99_vm3, %v98_v27  }
  0x86   :  { %v108_v28 = vpop.permute.xlu0 %107  }
  0x87   :  { %140 = vst.msk [vmem:[%s215_s1 + $0x8] sm:$0x7f] %vm99_vm3, %v108_v28  }

// kernel: up_forward.4
= control target key start
LH: loop header
LB: loop body
LE: loop exit
PB: predicated region body
PF: predicated region fallthrough
CT: control target
= control target key end

     0   :  { %v54_v0 = vlaneseq  ;;  %vm665_vm3 = vmmov 0   ;;  %v666_v36 = vmov 0   ;;  %vm240_vm8 = vcmask 523264   ;;  %s844_s2 = inlined_call_operand.vmem [shape: bf16[3,64,64], index: 2, kind: input, shape index: {}]   ;;  %s845_s0 = inlined_call_operand.vmem [shape: bf16[32,64], index: 0, kind: input, shape index: {}]   ;;  %s846_s1 = inlined_call_operand.vmem [shape: f32[2,64], index: 1, kind: input, shape index: {}]   ;;  %s847_s3 = inlined_call_operand.vmem [shape: f32[1,64], index: 3, kind: input, shape index: {}]   ;;  %s848_s4 = inlined_call_operand.vmem [shape: bf16[32,64], index: 4, kind: output, shape index: {0}]   ;;  %s849_s5 = inlined_call_operand.vmem [shape: f32[1,2,64], index: 5, kind: output, shape index: {1}]  }
   0x1   :  { %v653_v1 = vld [vmem:[%s844_s2 + $0x38] sm:$0xff]   ;;  %v655_v4 = vld [vmem:[%s844_s2 + $0x30] sm:$0xff]   ;;  %v657_v7 = vld [vmem:[%s844_s2 + $0x28] sm:$0xff]   ;;  %vm111_vm10 = vsmask.f32 256  ;;  %vm129_vm11 = vcmask 1040384  }
   0x2   :  { %v654_v2 = vld [vmem:[%s844_s2 + $0x18] sm:$0xff]   ;;  %v55_v3 = vshrl.u32 %v54_v0, 7  ;;  %615 = vmatprep.subr.bf16.mxu0 %v653_v1  ;;  %v656_v5 = vld [vmem:[%s844_s2 + $0x10] sm:$0xff]   ;;  %v658_v9 = vld [vmem:[%s844_s2 + $0x8] sm:$0xff]  }
   0x3   :  { %616 = vmatpush3.bf16.msra.mxu0 %v653_v1  ;;  %627 = vmatprep.subr.bf16.mxu1 %v654_v2  ;;  %v659_v12 = vld [vmem:[%s844_s2 + $0x20] sm:$0xff]   ;;  %v596_v15 = vld [vmem:[%s845_s0 + $0x8] sm:$0xff]   ;;  %vm141_vm4 = vmpackc.low %vm665_vm3, %vm665_vm3 }
   0x4   :  { %v63_v6 = vand.u32 15, %v55_v3  ;;  %628 = vmatpush3.bf16.msra.mxu1 %v654_v2  ;;  %617 = vmatprep.subr.bf16.mxu0 %v655_v4  ;;  %v57_v8 = vadd.s32 16, %v55_v3  ;;  %v56_v13 = vadd.s32 8, %v55_v3  ;;  %v589_v14 = vld [vmem:[%s845_s0] sm:$0xff]   ;;  %v594_v21 = vunpack.c.l.bf16 %v596_v15  ;;  %v661_v30 = vld [vmem:[%s844_s2 + $0x58] sm:$0xff]   ;;  %v662_v51 = vld [vmem:[%s844_s2 + $0x50] sm:$0xff]  }
   0x5   :  { %629 = vmatprep.subr.bf16.mxu1 %v656_v5  ;;  %v539_v16 = vld [vmem:[%s846_s1] ss:$0 sm:$0xff]  ;;  %v590_v19 = vunpack.c.l.bf16 %v589_v14  ;;  %v591_v20 = vunpack.c.h.bf16 %v589_v14  ;;  %v595_v22 = vunpack.c.h.bf16 %v596_v15  ;;  %v540_v23 = vld [vmem:[%s846_s1 + $0x1] ss:$0 sm:$0xff]  ;;  %v58_v25 = vadd.s32 24, %v55_v3  ;;  %vm781_vm13 = vmand %vm129_vm11, %vm111_vm10 }
   0x6   :  { %vm715_vm0 = vcmp.eq.s32.totalorder %v63_v6, 0  ;;  %v77_v11 = vand.u32 15, %v57_v8  ;;  %v660_v18 = vld [vmem:[%s844_s2] sm:$0xff]   ;;  %v70_v24 = vand.u32 15, %v56_v13  ;;  %v37_v28 = vmul.f32 %v594_v21, %v539_v16  ;;  %v663_v0 = vld [vmem:[%s844_s2 + $0x48] sm:$0xff]  }
   0x7   :  { %618 = vmatpush3.bf16.msra.mxu0 %v655_v4  ;;  %vm140_vm2 = vmpackc.low %vm715_vm0, %vm715_vm0  ;;  %v35_v26 = vmul.f32 %v590_v19, %v539_v16  ;;  %v36_v27 = vmul.f32 %v591_v20, %v539_v16  ;;  %v38_v29 = vmul.f32 %v595_v22, %v539_v16  ;;  %v759_v38 = vsel %vm141_vm4, 65537, %v666_v36 }
   0x8   :  { %630 = vmatpush3.bf16.msra.mxu1 %v656_v5  ;;  %619 = vmatprep.subr.bf16.mxu0 %v657_v7  ;;  %vm731_vm1 = vcmp.eq.s32.totalorder %v77_v11, 0  ;;  %vm750_vm6 = vcmp.eq.s32.totalorder %v70_v24, 15  ;;  %v46_v34 = vadd.f32 %v540_v23, %v37_v28  ;;  %v144_v37 = vsel %vm140_vm2, 65537, %v666_v36  ;;  %v664_v11 = vld [vmem:[%s844_s2 + $0x40] sm:$0xff]  }
   0x9   :  { %631 = vmatprep.subr.bf16.mxu1 %v658_v9  ;;  %vm142_vm5 = vmpackc.low %vm731_vm1, %vm731_vm1  ;;  %v44_v32 = vadd.f32 %v540_v23, %v35_v26  ;;  %v45_v33 = vadd.f32 %v540_v23, %v36_v27  ;;  %v47_v35 = vadd.f32 %v540_v23, %v38_v29  ;;  %v84_v40 = vand.u32 15, %v58_v25  ;;  %v579_v25 = vld [vmem:[%s847_s3] ss:$0 sm:$0xff] }
   0xa   :  { %v146_v39 = vsel %vm142_vm5, 65537, %v666_v36  ;;  %vm182_vm7 = vmpackc.low %vm750_vm6, %vm750_vm6  ;;  %v50_v43 = vmax.f32 %v46_v34, 0.0  ;;  %v541_v49 = vcombine.low %v144_v37, %v759_v38  ;;  %vm162_vm0 = vsmask.f32 7424 }
   0xb   :  { %620 = vmatpush3.bf16.msra.mxu0 %v657_v7  ;;  %v48_v41 = vmax.f32 %v44_v32, 0.0  ;;  %v49_v42 = vmax.f32 %v45_v33, 0.0  ;;  %v51_v44 = vmax.f32 %v47_v35, 0.0  ;;  %v186_v45 = vsel %vm182_vm7, 65537, %v666_v36 }
   0xc   :  { %632 = vmatpush3.bf16.msra.mxu1 %v658_v9  ;;  %621 = vmatprep.subr.bf16.mxu0 %v659_v12  ;;  %vm764_vm9 = vcmp.eq.s32.totalorder %v84_v40, 15  ;;  %v542_v50 = vcombine.low %v146_v39, %v759_v38  ;;  %v543_v52 = vcombine.low %v759_v38, %v186_v45  ;;  %vm785_vm14 = vcmp.ne.s16.totalorder %v541_v49, 0 }
   0xd   :  { %633 = vmatprep.subr.bf16.mxu1 %v660_v18  ;;  %v52_v47 = vpack.c.bf16 %v49_v42, %v48_v41  ;;  %v53_v48 = vpack.c.bf16 %v51_v44, %v50_v43  ;;  %vm184_vm12 = vmpackc.low %vm764_vm9, %vm764_vm9  ;;  %vm170_vm2 = vcmask 1047552   ;;  %vm526_vm5 = vcmask 519168  }
   0xe   :  { %vm789_vm15 = vcmp.ne.s16.totalorder %v542_v50, 0  ;;  %v188_v1 = vsel %vm184_vm12, 65537, %v666_v36  ;;  %vm195_vm1 = vcmp.ne.s16.totalorder %v543_v52, 0  ;;  %vm171_vm3 = vmand %vm170_vm2, %vm162_vm0  ;;  %vm508_vm6 = vcmask 517120  }
   0xf   :  { %622 = vmatpush3.bf16.msra.mxu0 %v659_v12  ;;  %623 = vmatprep.mubr.msk.bf16.mxu0 %vm240_vm8, %v52_v47  ;;  %v120_v53 = vshrl.u32 %v53_v48, 16  ;;  %v113_v54 = vshrl.u32 %v52_v47, 16  ;;  %v116_v55 = vshll.u32 %v52_v47, 16  ;;  %v123_v56 = vshll.u32 %v53_v48, 16 }
  0x10   :  { %634 = vmatpush3.bf16.msra.mxu1 %v660_v18  ;;  %639 = vmatprep.subr.bf16.mxu0 %v661_v30  ;;  %v544_v8 = vcombine.low %v759_v38, %v188_v1 }
  0x11   :  { %v115_v57 = vrot.slane %v113_v54, 7  ;;  %v163_v58 = vrot.slane %v116_v55, 1  ;;  %v122_v59 = vrot.slane %v120_v53, 7  ;;  %v165_v60 = vrot.slane %v123_v56, 1 }
  0x12   :  { %624 = vmatmul.mubr.msk.bf16.vlgmr.msra.gmra.mxu0 %vm240_vm8, %v53_v48  ;;  %vm196_vm4 = vcmp.ne.s16.totalorder %v544_v8, 0 }
  0x13   :  { %640 = vmatpush3.bf16.msra.mxu0 %v661_v30  ;;  %v118_v2 = vor.u32 %v116_v55, %v115_v57  ;;  %v125_v3 = vor.u32 %v123_v56, %v122_v59  ;;  %v164_v4 = vor.u32 %v163_v58, %v113_v54  ;;  %v167_v13 = vor.u32 %v165_v60, %v120_v53 }
  0x14   :  { %641 = vmatprep.subr.bf16.mxu0 %v662_v51 }
  0x15   :  { %v131_v5 = vsel %vm781_vm13, 0, %v118_v2  ;;  %v126_v6 = vsel %vm111_vm10, %v115_v57, %v125_v3  ;;  %v166_v7 = vsel %vm162_vm0, %v164_v4, %v165_v60  ;;  %v172_v14 = vsel %vm171_vm3, %v167_v13, 0 }
  0x16   :  { %v156_v9 = vsel %vm785_vm14, 0, %v131_v5  ;;  %v157_v10 = vsel %vm789_vm15, 0, %v126_v6  ;;  %v197_v12 = vsel %vm195_vm1, 0, %v166_v7  ;;  %v198_v15 = vsel %vm196_vm4, 0, %v172_v14 }
  0x17   :  { %642 = vmatpush3.bf16.msra.mxu0 %v662_v51  ;;  %635 = vmatprep.mubr.msk.bf16.mxu1 %vm240_vm8, %v156_v9 }
  0x18   :  { %643 = vmatprep.subr.bf16.mxu0 %v663_v0  ;;  %647 = vmatprep.mubr.msk.bf16.mxu0 %vm240_vm8, %v197_v12 }
  0x19   :  { %636 = vmatmul.mubr.msk.bf16.vlgmr.msra.gmra.mxu1 %vm240_vm8, %v157_v10 }
  0x1b   :  { %644 = vmatpush3.bf16.msra.mxu0 %v663_v0 }
  0x1c   :  { %645 = vmatprep.subr.bf16.mxu0 %v664_v11 }
  0x1f   :  { %646 = vmatpush3.bf16.msra.mxu0 %v664_v11 }
  0x22   :  { %648 = vmatmul.mubr.msk.bf16.vlgmr.msra.gmra.mxu0 %vm240_vm8, %v198_v15 }
  0xd2   :  { %v625_v16 = vpop.f32.mrf.mxu0 }
  0xd4   :  { %v279_v17 = vpop.f32.mrf.mxu0 }
  0xd6   :  { %v626_v19 = vpop.f32.mrf.mxu0 }
  0xd8   :  { %v282_v21 = vpop.f32.mrf.mxu0 }
  0xd9   :  { %v637_v18 = vpop.f32.mrf.mxu1 }
  0xda   :  { %v367_v22 = vadd.f32 %v637_v18, %v625_v16 }
  0xdb   :  { %v358_v20 = vpop.f32.mrf.mxu1 }
  0xdc   :  { %v359_v26 = vadd.f32 %v358_v20, %v279_v17 }
  0xdd   :  { %v638_v23 = vpop.f32.mrf.mxu1 }
  0xde   :  { %v370_v32 = vadd.f32 %v638_v23, %v626_v19 }
  0xdf   :  { %v361_v29 = vpop.f32.mrf.mxu1 }
  0xe0   :  { %v362_v36 = vadd.f32 %v361_v29, %v282_v21 }
  0xe2   :  { %v649_v24 = vpop.f32.mrf.mxu0 }
  0xe3   :  { %v463_v27 = vadd.f32 %v649_v24, %v367_v22 }
  0xe4   :  { %v446_v28 = vpop.f32.mrf.mxu0 }
  0xe5   :  { %v474_v30 = vadd.f32 %v579_v25, %v463_v27  ;;  %v461_v31 = vadd.f32 %v446_v28, %v359_v26 }
  0xe6   :  { %v650_v33 = vpop.f32.mrf.mxu0 }
  0xe7   :  { %v586_v34 = vpack.c.bf16 %v474_v30, %v474_v30  ;;  %v472_v35 = vadd.f32 %v579_v25, %v461_v31  ;;  %v464_v37 = vadd.f32 %v650_v33, %v370_v32  ;;  %v491_v45 = vmul.f32 %v474_v30, %v474_v30 }
  0xe8   :  { %v449_v38 = vpop.f32.mrf.mxu0  ;;  %v479_v51 = vsel %vm240_vm8, %v474_v30, 0.0 }
  0xe9   :  { %529 = vst.msk [vmem:[%s848_s4 + $0x8] sm:$0xf] %vm526_vm5, %v586_v34  ;;  %v584_v39 = vpack.c.bf16 %v472_v35, %v472_v35  ;;  %v475_v40 = vadd.f32 %v579_v25, %v464_v37  ;;  %v462_v41 = vadd.f32 %v449_v38, %v362_v36  ;;  %v489_v42 = vmul.f32 %v472_v35, %v472_v35 }
  0xea   :  { %v476_v46 = vsel %vm240_vm8, %v472_v35, 0.0  ;;  %v496_v57 = vsel %vm240_vm8, %v491_v45, 0.0 }
  0xeb   :  { %527 = vst.msk [vmem:[%s848_s4] sm:$0xf] %vm526_vm5, %v584_v39  ;;  %v587_v43 = vpack.c.bf16 %v475_v40, %v475_v40  ;;  %v473_v44 = vadd.f32 %v579_v25, %v462_v41  ;;  %v493_v52 = vsel %vm240_vm8, %v489_v42, 0.0  ;;  %v492_v53 = vmul.f32 %v475_v40, %v475_v40 }
  0xec   :  { %v481_v58 = vsel %vm240_vm8, %v475_v40, 0.0 }
  0xed   :  { %530 = vst.msk [vmem:[%s848_s4 + $0xc] sm:$0xf] %vm526_vm5, %v587_v43  ;;  %v477_v47 = vsel %vm240_vm8, %v473_v44, 0.0  ;;  %v490_v48 = vmul.f32 %v473_v44, %v473_v44  ;;  %v585_v49 = vpack.c.bf16 %v473_v44, %v473_v44  ;;  %v498_v61 = vsel %vm240_vm8, %v492_v53, 0.0 }
  0xee   :  { %v478_v50 = vadd.f32 %v477_v47, %v476_v46 }
  0xef   :  { %v494_v54 = vsel %vm240_vm8, %v490_v48, 0.0  ;;  %528 = vst.msk [vmem:[%s848_s4 + $0x4] sm:$0xf] %vm526_vm5, %v585_v49 }
  0xf0   :  { %v480_v55 = vadd.f32 %v479_v51, %v478_v50  ;;  %v495_v56 = vadd.f32 %v494_v54, %v493_v52 }
  0xf2   :  { %v482_v59 = vadd.f32 %v481_v58, %v480_v55  ;;  %v497_v60 = vadd.f32 %v496_v57, %v495_v56 }
  0xf4   :  { %v483_v62 = vrot.slane %v482_v59, 4  ;;  %v499_v63 = vadd.f32 %v498_v61, %v497_v60 }
  0xf6   :  { %v484_v0 = vadd.f32 %v483_v62, %v482_v59  ;;  %v500_v1 = vrot.slane %v499_v63, 4 }
  0xf8   :  { %v485_v2 = vrot.slane %v484_v0, 2  ;;  %v501_v3 = vadd.f32 %v500_v1, %v499_v63 }
  0xfa   :  { %v486_v4 = vadd.f32 %v485_v2, %v484_v0  ;;  %v502_v5 = vrot.slane %v501_v3, 2 }
  0xfc   :  { %v487_v6 = vrot.slane %v486_v4, 1  ;;  %v503_v7 = vadd.f32 %v502_v5, %v501_v3 }
  0xfe   :  { %v504_v8 = vrot.slane %v503_v7, 1  ;;  %v488_v9 = vadd.f32 %v487_v6, %v486_v4 }
 0x100   :  { %v505_v10 = vadd.f32 %v504_v8, %v503_v7 }
 0x102   :  { %v507_v11 = vsel %vm129_vm11, %v488_v9, %v505_v10 }
 0x103   :  { %509 = vst.msk [vmem:[%s849_s5] sm:$0x3] %vm508_vm6, %v507_v11 }

// kernel: up_forward.5
= control target key start
LH: loop header
LB: loop body
LE: loop exit
PB: predicated region body
PF: predicated region fallthrough
CT: control target
= control target key end

     0   :  { %s232_s0 = inlined_call_operand.vmem [shape: bf16[16,128], index: 0, kind: input, shape index: {}]   ;;  %s233_s1 = inlined_call_operand.vmem [shape: f32[15,128], index: 1, kind: input, shape index: {}]   ;;  %s234_s2 = inlined_call_operand.vmem [shape: f32[16,128], index: 2, kind: output, shape index: {}]  }
   0x1   :  { %v160_v0 = vld [vmem:[%s232_s0] sm:$0xff]   ;;  %v146_v13 = vld [vmem:[%s233_s1 + $0xe] ss:$0 sm:$0xff]  ;;  %v154_v18 = vld [vmem:[%s233_s1 + $0x8] ss:$0 sm:$0xff] }
   0x2   :  { %v144_v1 = vld [vmem:[%s233_s1] ss:$0 sm:$0xff]  ;;  %v161_v2 = vunpack.c.l.bf16 %v160_v0  ;;  %v162_v3 = vunpack.c.h.bf16 %v160_v0  ;;  %v145_v4 = vld [vmem:[%s233_s1 + $0x1] ss:$0 sm:$0xff]  ;;  %v147_v9 = vld [vmem:[%s233_s1 + $0x2] ss:$0 sm:$0xff] }
   0x3   :  { %v150_v10 = vld [vmem:[%s233_s1 + $0x3] ss:$0 sm:$0xff]  ;;  %v153_v11 = vld [vmem:[%s233_s1 + $0x4] ss:$0 sm:$0xff]  ;;  %v156_v14 = vld [vmem:[%s233_s1 + $0x5] ss:$0 sm:$0xff] }
   0x4   :  { %v20_v5 = vmul.f32 %v161_v2, %v144_v1  ;;  %v21_v6 = vmul.f32 %v162_v3, %v144_v1  ;;  %v148_v16 = vld [vmem:[%s233_s1 + $0x6] ss:$0 sm:$0xff]  ;;  %v151_v17 = vld [vmem:[%s233_s1 + $0x7] ss:$0 sm:$0xff]  ;;  %v157_v22 = vld [vmem:[%s233_s1 + $0x9] ss:$0 sm:$0xff] }
   0x5   :  { %v149_v31 = vld [vmem:[%s233_s1 + $0xa] ss:$0 sm:$0xff]  ;;  %v152_v32 = vld [vmem:[%s233_s1 + $0xb] ss:$0 sm:$0xff]  ;;  %v155_v41 = vld [vmem:[%s233_s1 + $0xc] ss:$0 sm:$0xff] }
   0x6   :  { %v27_v7 = vadd.f32 %v145_v4, %v20_v5  ;;  %v28_v8 = vadd.f32 %v145_v4, %v21_v6  ;;  %v158_v50 = vld [vmem:[%s233_s1 + $0xd] ss:$0 sm:$0xff] }
   0x8   :  { %v29_v12 = vmax.f32 %v27_v7, 0.0  ;;  %v30_v15 = vmax.f32 %v28_v8, 0.0 }
   0xa   :  { %v43_v19 = vmul.f32 %v147_v9, %v29_v12  ;;  %v68_v20 = vmul.f32 %v150_v10, %v29_v12  ;;  %v93_v21 = vmul.f32 %v153_v11, %v29_v12  ;;  %v36_v23 = vadd.f32 %v146_v13, %v29_v12 }
   0xb   :  { %v118_v24 = vmul.f32 %v156_v14, %v29_v12  ;;  %v44_v25 = vmul.f32 %v147_v9, %v30_v15  ;;  %v69_v26 = vmul.f32 %v150_v10, %v30_v15  ;;  %v94_v30 = vmul.f32 %v153_v11, %v30_v15 }
   0xc   :  { %v50_v27 = vadd.f32 %v148_v16, %v43_v19  ;;  %v75_v28 = vadd.f32 %v151_v17, %v68_v20  ;;  %v100_v29 = vadd.f32 %v154_v18, %v93_v21  ;;  %v119_v36 = vmul.f32 %v156_v14, %v30_v15 }
   0xd   :  { %v125_v33 = vadd.f32 %v157_v22, %v118_v24  ;;  %v51_v34 = vadd.f32 %v148_v16, %v44_v25  ;;  %v76_v35 = vadd.f32 %v151_v17, %v69_v26  ;;  %v101_v40 = vadd.f32 %v154_v18, %v94_v30 }
   0xe   :  { %v52_v37 = vmax.f32 %v50_v27, 0.0  ;;  %v77_v38 = vmax.f32 %v75_v28, 0.0  ;;  %v102_v39 = vmax.f32 %v100_v29, 0.0  ;;  %v37_v42 = vadd.f32 %v146_v13, %v30_v15 }
   0xf   :  { %v53_v43 = vmax.f32 %v51_v34, 0.0  ;;  %v78_v44 = vmax.f32 %v76_v35, 0.0  ;;  %v126_v45 = vadd.f32 %v157_v22, %v119_v36  ;;  %v127_v48 = vmax.f32 %v125_v33, 0.0 }
  0x10   :  { %v59_v46 = vmul.f32 %v149_v31, %v52_v37  ;;  %v84_v47 = vmul.f32 %v152_v32, %v77_v38  ;;  %v103_v49 = vmax.f32 %v101_v40, 0.0  ;;  %v109_v55 = vmul.f32 %v155_v41, %v102_v39 }
  0x11   :  { %v60_v51 = vmul.f32 %v149_v31, %v53_v43  ;;  %v85_v52 = vmul.f32 %v152_v32, %v78_v44  ;;  %v128_v53 = vmax.f32 %v126_v45, 0.0  ;;  %v134_v59 = vmul.f32 %v158_v50, %v127_v48 }
  0x12   :  { %v61_v54 = vadd.f32 %v59_v46, %v36_v23  ;;  %v110_v57 = vmul.f32 %v155_v41, %v103_v49 }
  0x13   :  { %v62_v56 = vadd.f32 %v60_v51, %v37_v42  ;;  %v135_v61 = vmul.f32 %v158_v50, %v128_v53 }
  0x14   :  { %v86_v58 = vadd.f32 %v84_v47, %v61_v54 }
  0x15   :  { %v87_v60 = vadd.f32 %v85_v52, %v62_v56 }
  0x16   :  { %v111_v62 = vadd.f32 %v109_v55, %v86_v58 }
  0x17   :  { %v112_v63 = vadd.f32 %v110_v57, %v87_v60 }
  0x18   :  { %v136_v0 = vadd.f32 %v134_v59, %v111_v62 }
  0x19   :  { %v137_v1 = vadd.f32 %v135_v61, %v112_v63 }
  0x1a   :  { %138 = vst [vmem:[%s234_s2] sm:$0xff] %v136_v0 }
  0x1b   :  { %139 = vst [vmem:[%s234_s2 + $0x8] sm:$0xff] %v137_v1 }

</bundles_post_ra>
